<compile_context>
chip_gen: v7x
topology: tpu7x:2x2x1
jax: 0.10.0
libtpu: 0.0.40
codegen_flags: <defaults>
</compile_context>

<pallas_src>
import functools

import jax
import jax.numpy as jnp
from jax.experimental import pallas as pl
from jax.experimental.pallas import tpu as pltpu


_NEG_INF = -1e30


# ----------------------------------------------------------------------------
# Phase 1: linear projection + per-head attention logits (one pass over nodes).
# ----------------------------------------------------------------------------
def gat_proj_kernel(x_ref, w_ref, a_ref, h_ref, e_ref):
    # h = x @ W  (bf16 operands, f32 accumulate on the MXU)
    h = jnp.dot(x_ref[...], w_ref[...], preferred_element_type=jnp.float32)
    hb = h.astype(jnp.bfloat16)
    # [el | er][n, :] = per-head inner products <h_head(n), attn_{l,r}[head]>
    # via a single MXU pass against the concatenated block-diagonal matrix.
    e_ref[...] = jnp.dot(hb, a_ref[...], preferred_element_type=jnp.float32)
    # keep h in bf16 node-major (N, H*D) for the phase-2 aggregation matmul
    h_ref[...] = hb


def gat_project(x_bf16, w_bf16, a_mat, *, tile_n):
    n, f_in = x_bf16.shape
    hd = w_bf16.shape[1]
    two_h = a_mat.shape[1]
    return pl.pallas_call(
        gat_proj_kernel,
        out_shape=(
            jax.ShapeDtypeStruct((n, hd), jnp.bfloat16),     # h
            jax.ShapeDtypeStruct((n, two_h), jnp.float32),   # [el | er]
        ),
        grid_spec=pltpu.PrefetchScalarGridSpec(
            num_scalar_prefetch=0,
            grid=(n // tile_n,),
            in_specs=[
                pl.BlockSpec((tile_n, f_in), lambda i: (i, 0)),
                pl.BlockSpec((f_in, hd), lambda i: (0, 0)),
                pl.BlockSpec((hd, two_h), lambda i: (0, 0)),
            ],
            out_specs=(
                pl.BlockSpec((tile_n, hd), lambda i: (i, 0)),
                pl.BlockSpec((tile_n, two_h), lambda i: (i, 0)),
            ),
        ),
        compiler_params=pltpu.CompilerParams(
            dimension_semantics=("parallel",)),
    )(x_bf16, w_bf16, a_mat)


# ----------------------------------------------------------------------------
# Phase 2: tiled masked softmax + neighborhood aggregation, all heads fused.
#   grid = (dst_tile, src_tile); src is the online-softmax reduction axis.
# ----------------------------------------------------------------------------
def gat_attn_kernel(counts_ref, mask_ref, el_ref, er_ref, h_ref, b_ref, o_ref,
                    m_scr, l_scr, acc_scr, *, neg_slope, num_heads, out_dim):
    i = pl.program_id(0)
    j = pl.program_id(1)

    @pl.when(j == 0)
    def _init():
        m_scr[...] = jnp.full_like(m_scr, _NEG_INF)
        l_scr[...] = jnp.zeros_like(l_scr)
        acc_scr[...] = jnp.zeros_like(acc_scr)

    # Skip tiles that contain no edges at all (block-sparse flash pattern).
    @pl.when(counts_ref[i, j] > 0)
    def _body():
        mask = mask_ref[...].astype(jnp.float32)      # (td, ts) additive mask
        hv = h_ref[...]                               # (ts, H*D) bf16
        elv = el_ref[...]                             # (H, ts)   f32 src logits
        erv = er_ref[...]                             # (td, H)   f32 dst logits
        for g in range(num_heads):                    # static unroll (H small)
            hsl = slice(g, g + 1)
            fsl = slice(g * out_dim, (g + 1) * out_dim)
            e = erv[:, hsl] + elv[g:g + 1, :]         # (td, ts)
            e = jnp.maximum(e, neg_slope * e) + mask  # leaky_relu + mask (1 add)
            m_prev = m_scr[:, hsl]
            m_new = jnp.maximum(m_prev, jnp.max(e, axis=1, keepdims=True))
            corr = jnp.exp(m_prev - m_new)
            p = jnp.exp(e - m_new)
            l_scr[:, hsl] = (corr * l_scr[:, hsl]
                             + jnp.sum(p, axis=1, keepdims=True))
            acc_scr[:, fsl] = corr * acc_scr[:, fsl] + jnp.dot(
                p.astype(jnp.bfloat16), hv[:, fsl],
                preferred_element_type=jnp.float32)
            m_scr[:, hsl] = m_new

    @pl.when(j == pl.num_programs(1) - 1)
    def _finish():
        # normalize AFTER the aggregation matmul; single lane-dense store of
        # all heads: (tile_dst, H*D) node-major, bias + relu fused.
        cols = []
        for g in range(num_heads):
            hsl = slice(g, g + 1)
            fsl = slice(g * out_dim, (g + 1) * out_dim)
            cols.append(acc_scr[:, fsl] / l_scr[:, hsl])
        out = jnp.concatenate(cols, axis=1) + b_ref[...]
        o_ref[...] = jnp.maximum(out, 0.0).astype(o_ref.dtype)


def gat_attend(counts, mask, el_t, er, h, b, *, tile_dst, tile_src,
               neg_slope, num_heads, out_dim, out_dtype):
    n = mask.shape[0]
    hd = num_heads * out_dim
    kern = functools.partial(gat_attn_kernel, neg_slope=neg_slope,
                             num_heads=num_heads, out_dim=out_dim)
    return pl.pallas_call(
        kern,
        out_shape=jax.ShapeDtypeStruct((n, hd), out_dtype),
        grid_spec=pltpu.PrefetchScalarGridSpec(
            num_scalar_prefetch=1,                     # per-tile edge counts
            grid=(n // tile_dst, n // tile_src),
            in_specs=[
                pl.BlockSpec((tile_dst, tile_src), lambda i, j, c: (i, j)),   # mask
                pl.BlockSpec((num_heads, tile_src), lambda i, j, c: (0, j)),  # el (H,N)
                pl.BlockSpec((tile_dst, num_heads), lambda i, j, c: (i, 0)),  # er (N,H)
                pl.BlockSpec((tile_src, hd), lambda i, j, c: (j, 0)),         # h  (N,HD)
                pl.BlockSpec((1, hd), lambda i, j, c: (0, 0)),                # bias
            ],
            out_specs=pl.BlockSpec((tile_dst, hd), lambda i, j, c: (i, 0)),
            scratch_shapes=[
                pltpu.VMEM((tile_dst, num_heads), jnp.float32),   # running max
                pltpu.VMEM((tile_dst, num_heads), jnp.float32),   # running sum
                pltpu.VMEM((tile_dst, hd), jnp.float32),          # running acc
            ],
        ),
        compiler_params=pltpu.CompilerParams(
            dimension_semantics=("parallel", "arbitrary")),
    )(counts, mask, el_t, er, h, b)


# ----------------------------------------------------------------------------
# Wrapper-side helpers (layout plumbing + tile choice only; no hoisted compute).
# ----------------------------------------------------------------------------
def _round_up(x, m):
    return ((x + m - 1) // m) * m


def _plan(n):
    """Padded node count and (tile_n, tile_dst, tile_src)."""
    if n <= 1024:
        n_pad = _round_up(n, 8)
        return n_pad, n_pad, n_pad, n_pad
    # Pad N to a tile multiple instead of falling back to full-extent blocks.
    n_pad = _round_up(n, 1024)
    # 512 x 2048 bf16 mask block = 2 MiB (double-buffered 4 MiB): fits v5e/v6e
    # defaults and v7x's 64 MiB; >= 2 dst tiles keeps both v7x TCs busy.
    tile_src = 2048 if n_pad % 2048 == 0 else 1024
    return n_pad, 1024, 512, tile_src


def _expand_attn(al, ar, num_heads, out_dim):
    # (H, D) attn_l/attn_r -> (H*D, 2H) [AL | AR] block-diagonal matrix so the
    # per-head inner products come out of a single MXU pass in phase 1.
    eye = jnp.eye(num_heads, dtype=jnp.float32)

    def blockdiag(a):
        return (a.astype(jnp.float32)[:, :, None] * eye[:, None, :]).reshape(
            num_heads * out_dim, num_heads)

    return jnp.concatenate([blockdiag(al), blockdiag(ar)],
                           axis=1).astype(jnp.bfloat16)


def _build_mask(adj, n_pad):
    """Additive bf16 mask: 0 where edge (adj[dst,src] > 0), -1e30 elsewhere."""
    n = adj.shape[0]
    m = jnp.where(adj > 0, 0.0, _NEG_INF).astype(jnp.float32)
    if n_pad > n:
        m = jnp.pad(m, ((0, n_pad - n), (0, n_pad - n)),
                    constant_values=_NEG_INF)
        idx = jnp.arange(n, n_pad)
        m = m.at[idx, idx].set(0.0)   # keep padded softmax rows well-defined
    return m.astype(jnp.bfloat16)


def _tile_edge_counts(mask, tile_dst, tile_src):
    n = mask.shape[0]
    edges = (mask == 0).astype(jnp.int32)
    n_dt, n_st = n // tile_dst, n // tile_src
    return edges.reshape(n_dt, tile_dst, n_st, tile_src).sum(
        axis=(1, 3)).astype(jnp.int32)


def gat_layer(x, w, al, ar, b, mask, counts, *, num_heads, out_dim,
              tile_n, tile_dst, tile_src, neg_slope=0.2,
              out_dtype=jnp.float32):
    hd = num_heads * out_dim

    # ---- phase 1: projection + attention logits, computed once per layer ----
    a_mat = _expand_attn(al, ar, num_heads, out_dim)
    h, e = gat_project(x.astype(jnp.bfloat16), w.astype(jnp.bfloat16),
                       a_mat, tile_n=tile_n)
    el_t = e[:, :num_heads].T            # (H, Np) f32, tiny transpose
    er = e[:, num_heads:]                # (Np, H) f32
    b2 = jnp.reshape(b, (1, hd)).astype(jnp.float32)

    # ---- phase 2: masked online softmax + aggregation, all heads fused ----
    return gat_attend(counts, mask, el_t, er, h, b2,
                      tile_dst=tile_dst, tile_src=tile_src,
                      neg_slope=neg_slope, num_heads=num_heads,
                      out_dim=out_dim, out_dtype=out_dtype)   # (Np, H*D)


def init_gat_conv_params(key, in_dim, out_dim, num_heads):
    k1, k2, k3 = jax.random.split(key, 3)
    w = jax.random.normal(k1, (in_dim, num_heads * out_dim),
                          jnp.float32) * (1.0 / jnp.sqrt(in_dim))
    al = jax.random.normal(k2, (num_heads, out_dim), jnp.float32) * 0.1
    ar = jax.random.normal(k3, (num_heads, out_dim), jnp.float32) * 0.1
    b = jnp.zeros((1, num_heads * out_dim), jnp.float32)
    return w, al, ar, b


def gat_model_forward(features, adj, params1, params2, *, num_heads,
                      hidden_dim):
    n = features.shape[0]
    n_pad, tile_n, tile_dst, tile_src = _plan(n)

    # adjacency -> additive bf16 mask + per-tile edge counts, built ONCE and
    # shared by both layers (adjacency is the dominant HBM stream).
    mask = _build_mask(adj, n_pad)
    counts = _tile_edge_counts(mask, tile_dst, tile_src)

    x = features
    if n_pad > n:
        x = jnp.pad(x, ((0, n_pad - n), (0, 0)))

    common = dict(num_heads=num_heads, out_dim=hidden_dim,
                  tile_n=tile_n, tile_dst=tile_dst, tile_src=tile_src)
    # conv1 (+ fused relu) -> hidden activations kept in bf16
    x = gat_layer(x, *params1, mask, counts, out_dtype=jnp.bfloat16, **common)
    # conv2 (+ fused relu) -> final output in f32
    x = gat_layer(x, *params2, mask, counts, out_dtype=jnp.float32, **common)

    # final shape like DGL GATConv output: (N, num_heads, hidden_dim)
    return x[:n].reshape(n, num_heads, hidden_dim)


if __name__ == "__main__":
    num_nodes = 16
    in_dim = 8
    hidden_dim = 8
    num_heads = 4

    key = jax.random.PRNGKey(0)
    kf, k1, k2 = jax.random.split(key, 3)

    # node features
    features = jax.random.normal(kf, (num_nodes, in_dim), jnp.float32)

    # deterministic graph: ring (u -> u+1) plus self loops (dgl.add_self_loop)
    adj = jnp.zeros((num_nodes, num_nodes), jnp.float32)
    src = jnp.arange(num_nodes)
    dst = (src + 1) % num_nodes
    adj = adj.at[dst, src].set(1.0)                      # adj[dst, src]
    adj = adj + jnp.eye(num_nodes, dtype=jnp.float32)    # self loops

    params1 = init_gat_conv_params(k1, in_dim, hidden_dim, num_heads)
    params2 = init_gat_conv_params(k2, hidden_dim * num_heads, hidden_dim,
                                   num_heads)

    fwd = jax.jit(functools.partial(gat_model_forward,
                                    num_heads=num_heads,
                                    hidden_dim=hidden_dim))
    out = fwd(features, adj, params1, params2)
    out = jax.block_until_ready(out)
    assert out.shape == (num_nodes, num_heads, hidden_dim)
    assert bool(jnp.all(jnp.isfinite(out)))
    print("KERNEL_OK")
</pallas_src>

<mosaic_0001>
module attributes {stable_mosaic.version = 11 : i64} {
  func.func @gat_proj_kernel(%arg0: i32, %arg1: memref<16x8xbf16, #tpu.memory_space<vmem>>, %arg2: memref<8x32xbf16, #tpu.memory_space<vmem>>, %arg3: memref<32x8xbf16, #tpu.memory_space<vmem>>, %arg4: memref<16x32xbf16, #tpu.memory_space<vmem>>, %arg5: memref<16x8xf32, #tpu.memory_space<vmem>>) attributes {dimension_semantics = [#tpu.dimension_semantics<parallel>], iteration_bounds = array<i64: 1>, scalar_prefetch = 0 : i64, scratch_operands = 0 : i64, tpu.core_type = #tpu.core_type<tc>, window_params = [{transform_indices = @transform_0, window_bounds = array<i64: 16, 8>}, {pipeline_mode = #tpu.pipeline_mode<synchronous>, transform_indices = @transform_1, window_bounds = array<i64: 8, 32>}, {pipeline_mode = #tpu.pipeline_mode<synchronous>, transform_indices = @transform_2, window_bounds = array<i64: 32, 8>}, {transform_indices = @transform_3, window_bounds = array<i64: 16, 32>}, {transform_indices = @transform_4, window_bounds = array<i64: 16, 8>}]} {
    %c0 = arith.constant 0 : index
    %c0_0 = arith.constant 0 : index
    %0 = vector.load %arg1[%c0, %c0_0] : memref<16x8xbf16, #tpu.memory_space<vmem>>, vector<16x8xbf16>
    %c0_1 = arith.constant 0 : index
    %c0_2 = arith.constant 0 : index
    %1 = vector.load %arg2[%c0_1, %c0_2] : memref<8x32xbf16, #tpu.memory_space<vmem>>, vector<8x32xbf16>
    %cst = arith.constant dense<0.000000e+00> : vector<16x32xf32>
    %2 = tpu.matmul %0, %1, %cst {dimension_numbers = #tpu.dot_dimension_numbers<[1], [0], [0], [1], [0, 0, 1, 1], [], []>} : vector<16x8xbf16>, vector<8x32xbf16>, vector<16x32xf32> -> vector<16x32xf32>
    %3 = arith.truncf %2 : vector<16x32xf32> to vector<16x32xbf16>
    %c0_3 = arith.constant 0 : index
    %c0_4 = arith.constant 0 : index
    %4 = vector.load %arg3[%c0_3, %c0_4] : memref<32x8xbf16, #tpu.memory_space<vmem>>, vector<32x8xbf16>
    %cst_5 = arith.constant dense<0.000000e+00> : vector<16x8xf32>
    %5 = tpu.matmul %3, %4, %cst_5 {dimension_numbers = #tpu.dot_dimension_numbers<[1], [0], [0], [1], [0, 0, 1, 1], [], []>} : vector<16x32xbf16>, vector<32x8xbf16>, vector<16x8xf32> -> vector<16x8xf32>
    %c0_6 = arith.constant 0 : index
    %c0_7 = arith.constant 0 : index
    %6 = vector.load %arg5[%c0_6, %c0_7] : memref<16x8xf32, #tpu.memory_space<vmem>>, vector<16x8xf32>
    tpu.vector_store %arg5[%c0_6, %c0_7], %5 {strides = array<i32>} : memref<16x8xf32, #tpu.memory_space<vmem>>, vector<16x8xf32>,
    %c0_8 = arith.constant 0 : index
    %c0_9 = arith.constant 0 : index
    %7 = vector.load %arg4[%c0_8, %c0_9] : memref<16x32xbf16, #tpu.memory_space<vmem>>, vector<16x32xbf16>
    tpu.vector_store %arg4[%c0_8, %c0_9], %3 {strides = array<i32>} : memref<16x32xbf16, #tpu.memory_space<vmem>>, vector<16x32xbf16>,
    return
  }
  func.func @transform_0(%arg0: i32) -> (i32, i32) {
    %c0_i32 = arith.constant 0 : i32
    %c0_i32_0 = arith.constant 0 : i32
    return %arg0, %c0_i32 : i32, i32
  }
  func.func @transform_1(%arg0: i32) -> (i32, i32) {
    %c0_i32 = arith.constant 0 : i32
    %c0_i32_0 = arith.constant 0 : i32
    %c0_i32_1 = arith.constant 0 : i32
    return %c0_i32, %c0_i32_0 : i32, i32
  }
  func.func @transform_2(%arg0: i32) -> (i32, i32) {
    %c0_i32 = arith.constant 0 : i32
    %c0_i32_0 = arith.constant 0 : i32
    %c0_i32_1 = arith.constant 0 : i32
    return %c0_i32, %c0_i32_0 : i32, i32
  }
  func.func @transform_3(%arg0: i32) -> (i32, i32) {
    %c0_i32 = arith.constant 0 : i32
    %c0_i32_0 = arith.constant 0 : i32
    return %arg0, %c0_i32 : i32, i32
  }
  func.func @transform_4(%arg0: i32) -> (i32, i32) {
    %c0_i32 = arith.constant 0 : i32
    %c0_i32_0 = arith.constant 0 : i32
    return %arg0, %c0_i32 : i32, i32
  }
}

module attributes {stable_mosaic.version = 11 : i64} {
  func.func @gat_proj_kernel(%arg0: i32, %arg1: memref<16x32xbf16, #tpu.memory_space<vmem>>, %arg2: memref<32x32xbf16, #tpu.memory_space<vmem>>, %arg3: memref<32x8xbf16, #tpu.memory_space<vmem>>, %arg4: memref<16x32xbf16, #tpu.memory_space<vmem>>, %arg5: memref<16x8xf32, #tpu.memory_space<vmem>>) attributes {dimension_semantics = [#tpu.dimension_semantics<parallel>], iteration_bounds = array<i64: 1>, scalar_prefetch = 0 : i64, scratch_operands = 0 : i64, tpu.core_type = #tpu.core_type<tc>, window_params = [{transform_indices = @transform_0, window_bounds = array<i64: 16, 32>}, {pipeline_mode = #tpu.pipeline_mode<synchronous>, transform_indices = @transform_1, window_bounds = array<i64: 32, 32>}, {pipeline_mode = #tpu.pipeline_mode<synchronous>, transform_indices = @transform_2, window_bounds = array<i64: 32, 8>}, {transform_indices = @transform_3, window_bounds = array<i64: 16, 32>}, {transform_indices = @transform_4, window_bounds = array<i64: 16, 8>}]} {
    %c0 = arith.constant 0 : index
    %c0_0 = arith.constant 0 : index
    %0 = vector.load %arg1[%c0, %c0_0] : memref<16x32xbf16, #tpu.memory_space<vmem>>, vector<16x32xbf16>
    %c0_1 = arith.constant 0 : index
    %c0_2 = arith.constant 0 : index
    %1 = vector.load %arg2[%c0_1, %c0_2] : memref<32x32xbf16, #tpu.memory_space<vmem>>, vector<32x32xbf16>
    %cst = arith.constant dense<0.000000e+00> : vector<16x32xf32>
    %2 = tpu.matmul %0, %1, %cst {dimension_numbers = #tpu.dot_dimension_numbers<[1], [0], [0], [1], [0, 0, 1, 1], [], []>} : vector<16x32xbf16>, vector<32x32xbf16>, vector<16x32xf32> -> vector<16x32xf32>
    %3 = arith.truncf %2 : vector<16x32xf32> to vector<16x32xbf16>
    %c0_3 = arith.constant 0 : index
    %c0_4 = arith.constant 0 : index
    %4 = vector.load %arg3[%c0_3, %c0_4] : memref<32x8xbf16, #tpu.memory_space<vmem>>, vector<32x8xbf16>
    %cst_5 = arith.constant dense<0.000000e+00> : vector<16x8xf32>
    %5 = tpu.matmul %3, %4, %cst_5 {dimension_numbers = #tpu.dot_dimension_numbers<[1], [0], [0], [1], [0, 0, 1, 1], [], []>} : vector<16x32xbf16>, vector<32x8xbf16>, vector<16x8xf32> -> vector<16x8xf32>
    %c0_6 = arith.constant 0 : index
    %c0_7 = arith.constant 0 : index
    %6 = vector.load %arg5[%c0_6, %c0_7] : memref<16x8xf32, #tpu.memory_space<vmem>>, vector<16x8xf32>
    tpu.vector_store %arg5[%c0_6, %c0_7], %5 {strides = array<i32>} : memref<16x8xf32, #tpu.memory_space<vmem>>, vector<16x8xf32>,
    %c0_8 = arith.constant 0 : index
    %c0_9 = arith.constant 0 : index
    %7 = vector.load %arg4[%c0_8, %c0_9] : memref<16x32xbf16, #tpu.memory_space<vmem>>, vector<16x32xbf16>
    tpu.vector_store %arg4[%c0_8, %c0_9], %3 {strides = array<i32>} : memref<16x32xbf16, #tpu.memory_space<vmem>>, vector<16x32xbf16>,
    return
  }
  func.func @transform_0(%arg0: i32) -> (i32, i32) {
    %c0_i32 = arith.constant 0 : i32
    %c0_i32_0 = arith.constant 0 : i32
    return %arg0, %c0_i32 : i32, i32
  }
  func.func @transform_1(%arg0: i32) -> (i32, i32) {
    %c0_i32 = arith.constant 0 : i32
    %c0_i32_0 = arith.constant 0 : i32
    %c0_i32_1 = arith.constant 0 : i32
    return %c0_i32, %c0_i32_0 : i32, i32
  }
  func.func @transform_2(%arg0: i32) -> (i32, i32) {
    %c0_i32 = arith.constant 0 : i32
    %c0_i32_0 = arith.constant 0 : i32
    %c0_i32_1 = arith.constant 0 : i32
    return %c0_i32, %c0_i32_0 : i32, i32
  }
  func.func @transform_3(%arg0: i32) -> (i32, i32) {
    %c0_i32 = arith.constant 0 : i32
    %c0_i32_0 = arith.constant 0 : i32
    return %arg0, %c0_i32 : i32, i32
  }
  func.func @transform_4(%arg0: i32) -> (i32, i32) {
    %c0_i32 = arith.constant 0 : i32
    %c0_i32_0 = arith.constant 0 : i32
    return %arg0, %c0_i32 : i32, i32
  }
}

module attributes {stable_mosaic.version = 11 : i64} {
  func.func @gat_attn_kernel(%arg0: i32, %arg1: i32, %arg2: memref<1x1xi32, #tpu.memory_space<smem>>, %arg3: memref<16x16xbf16, #tpu.memory_space<vmem>>, %arg4: memref<4x16xf32, #tpu.memory_space<vmem>>, %arg5: memref<16x4xf32, #tpu.memory_space<vmem>>, %arg6: memref<16x32xbf16, #tpu.memory_space<vmem>>, %arg7: memref<1x32xf32, #tpu.memory_space<vmem>>, %arg8: memref<16x32xbf16, #tpu.memory_space<vmem>>, %arg9: memref<16x4xf32, #tpu.memory_space<vmem>>, %arg10: memref<16x4xf32, #tpu.memory_space<vmem>>, %arg11: memref<16x32xf32, #tpu.memory_space<vmem>>) attributes {dimension_semantics = [#tpu.dimension_semantics<parallel>, #tpu.dimension_semantics<arbitrary>], iteration_bounds = array<i64: 1, 1>, scalar_prefetch = 1 : i64, scratch_operands = 3 : i64, tpu.core_type = #tpu.core_type<tc>, window_params = [{transform_indices = @transform_0, window_bounds = array<i64: 16, 16>}, {transform_indices = @transform_1, window_bounds = array<i64: 4, 16>}, {transform_indices = @transform_2, window_bounds = array<i64: 16, 4>}, {transform_indices = @transform_3, window_bounds = array<i64: 16, 32>}, {pipeline_mode = #tpu.pipeline_mode<synchronous>, transform_indices = @transform_4, window_bounds = array<i64: 1, 32>}, {transform_indices = @transform_5, window_bounds = array<i64: 16, 32>}]} {
    %c0_i32 = arith.constant 0 : i32
    %0 = arith.cmpi eq, %arg1, %c0_i32 : i32
    %1 = arith.extui %0 : i1 to i32
    %c0_i32_0 = arith.constant 0 : i32
    %2 = arith.cmpi ne, %1, %c0_i32_0 : i32
    scf.if %2 {
      %cst = arith.constant -1.000000e+30 : f32
      %12 = vector.broadcast %cst : f32 to vector<16x4xf32>
      %c0 = arith.constant 0 : index
      %c0_5 = arith.constant 0 : index
      %13 = vector.load %arg9[%c0, %c0_5] : memref<16x4xf32, #tpu.memory_space<vmem>>, vector<16x4xf32>
      tpu.vector_store %arg9[%c0, %c0_5], %12 {strides = array<i32>} : memref<16x4xf32, #tpu.memory_space<vmem>>, vector<16x4xf32>,
      %cst_6 = arith.constant 0.000000e+00 : f32
      %14 = vector.broadcast %cst_6 : f32 to vector<16x4xf32>
      %c0_7 = arith.constant 0 : index
      %c0_8 = arith.constant 0 : index
      %15 = vector.load %arg10[%c0_7, %c0_8] : memref<16x4xf32, #tpu.memory_space<vmem>>, vector<16x4xf32>
      tpu.vector_store %arg10[%c0_7, %c0_8], %14 {strides = array<i32>} : memref<16x4xf32, #tpu.memory_space<vmem>>, vector<16x4xf32>,
      %cst_9 = arith.constant 0.000000e+00 : f32
      %16 = vector.broadcast %cst_9 : f32 to vector<16x32xf32>
      %c0_10 = arith.constant 0 : index
      %c0_11 = arith.constant 0 : index
      %17 = vector.load %arg11[%c0_10, %c0_11] : memref<16x32xf32, #tpu.memory_space<vmem>>, vector<16x32xf32>
      tpu.vector_store %arg11[%c0_10, %c0_11], %16 {strides = array<i32>} : memref<16x32xf32, #tpu.memory_space<vmem>>, vector<16x32xf32>,
    } else {
    }
    %3 = arith.index_cast %arg0 : i32 to index
    %4 = arith.index_cast %arg1 : i32 to index
    %5 = memref.load %arg2[%3, %4] : memref<1x1xi32, #tpu.memory_space<smem>>
    %c0_i32_1 = arith.constant 0 : i32
    %6 = arith.cmpi sgt, %5, %c0_i32_1 : i32
    %7 = arith.extui %6 : i1 to i32
    %c0_i32_2 = arith.constant 0 : i32
    %8 = arith.cmpi ne, %7, %c0_i32_2 : i32
    scf.if %8 {
      %c0 = arith.constant 0 : index
      %c0_5 = arith.constant 0 : index
      %12 = vector.load %arg3[%c0, %c0_5] : memref<16x16xbf16, #tpu.memory_space<vmem>>, vector<16x16xbf16>
      %13 = arith.extf %12 : vector<16x16xbf16> to vector<16x16xf32>
      %c0_6 = arith.constant 0 : index
      %c0_7 = arith.constant 0 : index
      %14 = vector.load %arg6[%c0_6, %c0_7] : memref<16x32xbf16, #tpu.memory_space<vmem>>, vector<16x32xbf16>
      %c0_8 = arith.constant 0 : index
      %c0_9 = arith.constant 0 : index
      %15 = vector.load %arg4[%c0_8, %c0_9] : memref<4x16xf32, #tpu.memory_space<vmem>>, vector<4x16xf32>
      %c0_10 = arith.constant 0 : index
      %c0_11 = arith.constant 0 : index
      %16 = vector.load %arg5[%c0_10, %c0_11] : memref<16x4xf32, #tpu.memory_space<vmem>>, vector<16x4xf32>
      %17 = vector.extract_strided_slice %16 {offsets = [0, 0], sizes = [16, 1], strides = [1, 1]} : vector<16x4xf32> to vector<16x1xf32>
      %18 = vector.extract_strided_slice %15 {offsets = [0, 0], sizes = [1, 16], strides = [1, 1]} : vector<4x16xf32> to vector<1x16xf32>
      %19 = vector.broadcast %17 : vector<16x1xf32> to vector<16x16xf32>
      %20 = vector.broadcast %18 : vector<1x16xf32> to vector<16x16xf32>
      %21 = arith.addf %19, %20 : vector<16x16xf32>
      %cst = arith.constant 2.000000e-01 : f32
      %22 = vector.broadcast %cst : f32 to vector<16x16xf32>
      %23 = arith.mulf %22, %21 : vector<16x16xf32>
      %24 = arith.maximumf %21, %23 : vector<16x16xf32>
      %25 = arith.addf %24, %13 : vector<16x16xf32>
      %c0_12 = arith.constant 0 : index
      %c0_13 = arith.constant 0 : index
      %26 = vector.load %arg9[%c0_12, %c0_13] : memref<16x4xf32, #tpu.memory_space<vmem>>, vector<16x1xf32>
      %cst_14 = arith.constant dense<0xFF800000> : vector<16xf32>
      %27 = vector.multi_reduction <maximumf>, %25, %cst_14 [1] : vector<16x16xf32> to vector<16xf32>
      %28 = vector.shape_cast %27 : vector<16xf32> to vector<16x1xf32>
      %29 = arith.maximumf %26, %28 : vector<16x1xf32>
      %30 = arith.subf %26, %29 : vector<16x1xf32>
      %31 = math.exp %30 : vector<16x1xf32>
      %32 = vector.broadcast %29 : vector<16x1xf32> to vector<16x16xf32>
      %33 = arith.subf %25, %32 : vector<16x16xf32>
      %34 = math.exp %33 : vector<16x16xf32>
      %c0_15 = arith.constant 0 : index
      %c0_16 = arith.constant 0 : index
      %35 = vector.load %arg10[%c0_15, %c0_16] : memref<16x4xf32, #tpu.memory_space<vmem>>, vector<16x1xf32>
      %36 = arith.mulf %31, %35 : vector<16x1xf32>
      %cst_17 = arith.constant dense<0.000000e+00> : vector<16xf32>
      %37 = vector.multi_reduction <add>, %34, %cst_17 [1] : vector<16x16xf32> to vector<16xf32>
      %38 = vector.shape_cast %37 : vector<16xf32> to vector<16x1xf32>
      %39 = arith.addf %36, %38 : vector<16x1xf32>
      %c0_18 = arith.constant 0 : index
      %c0_19 = arith.constant 0 : index
      %40 = vector.load %arg10[%c0_18, %c0_19] : memref<16x4xf32, #tpu.memory_space<vmem>>, vector<16x1xf32>
      tpu.vector_store %arg10[%c0_18, %c0_19], %39 {strides = array<i32>} : memref<16x4xf32, #tpu.memory_space<vmem>>, vector<16x1xf32>,
      %c0_20 = arith.constant 0 : index
      %c0_21 = arith.constant 0 : index
      %41 = vector.load %arg11[%c0_20, %c0_21] : memref<16x32xf32, #tpu.memory_space<vmem>>, vector<16x8xf32>
      %42 = vector.broadcast %31 : vector<16x1xf32> to vector<16x8xf32>
      %43 = arith.mulf %42, %41 : vector<16x8xf32>
      %44 = arith.truncf %34 : vector<16x16xf32> to vector<16x16xbf16>
      %45 = vector.extract_strided_slice %14 {offsets = [0, 0], sizes = [16, 8], strides = [1, 1]} : vector<16x32xbf16> to vector<16x8xbf16>
      %cst_22 = arith.constant dense<0.000000e+00> : vector<16x8xf32>
      %46 = tpu.matmul %44, %45, %cst_22 {dimension_numbers = #tpu.dot_dimension_numbers<[1], [0], [0], [1], [0, 0, 1, 1], [], []>} : vector<16x16xbf16>, vector<16x8xbf16>, vector<16x8xf32> -> vector<16x8xf32>
      %47 = arith.addf %43, %46 : vector<16x8xf32>
      %c0_23 = arith.constant 0 : index
      %c0_24 = arith.constant 0 : index
      %48 = vector.load %arg11[%c0_23, %c0_24] : memref<16x32xf32, #tpu.memory_space<vmem>>, vector<16x8xf32>
      tpu.vector_store %arg11[%c0_23, %c0_24], %47 {strides = array<i32>} : memref<16x32xf32, #tpu.memory_space<vmem>>, vector<16x8xf32>,
      %c0_25 = arith.constant 0 : index
      %c0_26 = arith.constant 0 : index
      %49 = vector.load %arg9[%c0_25, %c0_26] : memref<16x4xf32, #tpu.memory_space<vmem>>, vector<16x1xf32>
      tpu.vector_store %arg9[%c0_25, %c0_26], %29 {strides = array<i32>} : memref<16x4xf32, #tpu.memory_space<vmem>>, vector<16x1xf32>,
      %50 = vector.extract_strided_slice %16 {offsets = [0, 1], sizes = [16, 1], strides = [1, 1]} : vector<16x4xf32> to vector<16x1xf32>
      %51 = vector.extract_strided_slice %15 {offsets = [1, 0], sizes = [1, 16], strides = [1, 1]} : vector<4x16xf32> to vector<1x16xf32>
      %52 = vector.broadcast %50 : vector<16x1xf32> to vector<16x16xf32>
      %53 = vector.broadcast %51 : vector<1x16xf32> to vector<16x16xf32>
      %54 = arith.addf %52, %53 : vector<16x16xf32>
      %cst_27 = arith.constant 2.000000e-01 : f32
      %55 = vector.broadcast %cst_27 : f32 to vector<16x16xf32>
      %56 = arith.mulf %55, %54 : vector<16x16xf32>
      %57 = arith.maximumf %54, %56 : vector<16x16xf32>
      %58 = arith.addf %57, %13 : vector<16x16xf32>
      %c0_28 = arith.constant 0 : index
      %c1 = arith.constant 1 : index
      %59 = vector.load %arg9[%c0_28, %c1] : memref<16x4xf32, #tpu.memory_space<vmem>>, vector<16x1xf32>
      %cst_29 = arith.constant dense<0xFF800000> : vector<16xf32>
      %60 = vector.multi_reduction <maximumf>, %58, %cst_29 [1] : vector<16x16xf32> to vector<16xf32>
      %61 = vector.shape_cast %60 : vector<16xf32> to vector<16x1xf32>
      %62 = arith.maximumf %59, %61 : vector<16x1xf32>
      %63 = arith.subf %59, %62 : vector<16x1xf32>
      %64 = math.exp %63 : vector<16x1xf32>
      %65 = vector.broadcast %62 : vector<16x1xf32> to vector<16x16xf32>
      %66 = arith.subf %58, %65 : vector<16x16xf32>
      %67 = math.exp %66 : vector<16x16xf32>
      %c0_30 = arith.constant 0 : index
      %c1_31 = arith.constant 1 : index
      %68 = vector.load %arg10[%c0_30, %c1_31] : memref<16x4xf32, #tpu.memory_space<vmem>>, vector<16x1xf32>
      %69 = arith.mulf %64, %68 : vector<16x1xf32>
      %cst_32 = arith.constant dense<0.000000e+00> : vector<16xf32>
      %70 = vector.multi_reduction <add>, %67, %cst_32 [1] : vector<16x16xf32> to vector<16xf32>
      %71 = vector.shape_cast %70 : vector<16xf32> to vector<16x1xf32>
      %72 = arith.addf %69, %71 : vector<16x1xf32>
      %c0_33 = arith.constant 0 : index
      %c1_34 = arith.constant 1 : index
      %73 = vector.load %arg10[%c0_33, %c1_34] : memref<16x4xf32, #tpu.memory_space<vmem>>, vector<16x1xf32>
      tpu.vector_store %arg10[%c0_33, %c1_34], %72 {strides = array<i32>} : memref<16x4xf32, #tpu.memory_space<vmem>>, vector<16x1xf32>,
      %c0_35 = arith.constant 0 : index
      %c8 = arith.constant 8 : index
      %74 = vector.load %arg11[%c0_35, %c8] : memref<16x32xf32, #tpu.memory_space<vmem>>, vector<16x8xf32>
      %75 = vector.broadcast %64 : vector<16x1xf32> to vector<16x8xf32>
      %76 = arith.mulf %75, %74 : vector<16x8xf32>
      %77 = arith.truncf %67 : vector<16x16xf32> to vector<16x16xbf16>
      %78 = vector.extract_strided_slice %14 {offsets = [0, 8], sizes = [16, 8], strides = [1, 1]} : vector<16x32xbf16> to vector<16x8xbf16>
      %cst_36 = arith.constant dense<0.000000e+00> : vector<16x8xf32>
      %79 = tpu.matmul %77, %78, %cst_36 {dimension_numbers = #tpu.dot_dimension_numbers<[1], [0], [0], [1], [0, 0, 1, 1], [], []>} : vector<16x16xbf16>, vector<16x8xbf16>, vector<16x8xf32> -> vector<16x8xf32>
      %80 = arith.addf %76, %79 : vector<16x8xf32>
      %c0_37 = arith.constant 0 : index
      %c8_38 = arith.constant 8 : index
      %81 = vector.load %arg11[%c0_37, %c8_38] : memref<16x32xf32, #tpu.memory_space<vmem>>, vector<16x8xf32>
      tpu.vector_store %arg11[%c0_37, %c8_38], %80 {strides = array<i32>} : memref<16x32xf32, #tpu.memory_space<vmem>>, vector<16x8xf32>,
      %c0_39 = arith.constant 0 : index
      %c1_40 = arith.constant 1 : index
      %82 = vector.load %arg9[%c0_39, %c1_40] : memref<16x4xf32, #tpu.memory_space<vmem>>, vector<16x1xf32>
      tpu.vector_store %arg9[%c0_39, %c1_40], %62 {strides = array<i32>} : memref<16x4xf32, #tpu.memory_space<vmem>>, vector<16x1xf32>,
      %83 = vector.extract_strided_slice %16 {offsets = [0, 2], sizes = [16, 1], strides = [1, 1]} : vector<16x4xf32> to vector<16x1xf32>
      %84 = vector.extract_strided_slice %15 {offsets = [2, 0], sizes = [1, 16], strides = [1, 1]} : vector<4x16xf32> to vector<1x16xf32>
      %85 = vector.broadcast %83 : vector<16x1xf32> to vector<16x16xf32>
      %86 = vector.broadcast %84 : vector<1x16xf32> to vector<16x16xf32>
      %87 = arith.addf %85, %86 : vector<16x16xf32>
      %cst_41 = arith.constant 2.000000e-01 : f32
      %88 = vector.broadcast %cst_41 : f32 to vector<16x16xf32>
      %89 = arith.mulf %88, %87 : vector<16x16xf32>
      %90 = arith.maximumf %87, %89 : vector<16x16xf32>
      %91 = arith.addf %90, %13 : vector<16x16xf32>
      %c0_42 = arith.constant 0 : index
      %c2 = arith.constant 2 : index
      %92 = vector.load %arg9[%c0_42, %c2] : memref<16x4xf32, #tpu.memory_space<vmem>>, vector<16x1xf32>
      %cst_43 = arith.constant dense<0xFF800000> : vector<16xf32>
      %93 = vector.multi_reduction <maximumf>, %91, %cst_43 [1] : vector<16x16xf32> to vector<16xf32>
      %94 = vector.shape_cast %93 : vector<16xf32> to vector<16x1xf32>
      %95 = arith.maximumf %92, %94 : vector<16x1xf32>
      %96 = arith.subf %92, %95 : vector<16x1xf32>
      %97 = math.exp %96 : vector<16x1xf32>
      %98 = vector.broadcast %95 : vector<16x1xf32> to vector<16x16xf32>
      %99 = arith.subf %91, %98 : vector<16x16xf32>
      %100 = math.exp %99 : vector<16x16xf32>
      %c0_44 = arith.constant 0 : index
      %c2_45 = arith.constant 2 : index
      %101 = vector.load %arg10[%c0_44, %c2_45] : memref<16x4xf32, #tpu.memory_space<vmem>>, vector<16x1xf32>
      %102 = arith.mulf %97, %101 : vector<16x1xf32>
      %cst_46 = arith.constant dense<0.000000e+00> : vector<16xf32>
      %103 = vector.multi_reduction <add>, %100, %cst_46 [1] : vector<16x16xf32> to vector<16xf32>
      %104 = vector.shape_cast %103 : vector<16xf32> to vector<16x1xf32>
      %105 = arith.addf %102, %104 : vector<16x1xf32>
      %c0_47 = arith.constant 0 : index
      %c2_48 = arith.constant 2 : index
      %106 = vector.load %arg10[%c0_47, %c2_48] : memref<16x4xf32, #tpu.memory_space<vmem>>, vector<16x1xf32>
      tpu.vector_store %arg10[%c0_47, %c2_48], %105 {strides = array<i32>} : memref<16x4xf32, #tpu.memory_space<vmem>>, vector<16x1xf32>,
      %c0_49 = arith.constant 0 : index
      %c16 = arith.constant 16 : index
      %107 = vector.load %arg11[%c0_49, %c16] : memref<16x32xf32, #tpu.memory_space<vmem>>, vector<16x8xf32>
      %108 = vector.broadcast %97 : vector<16x1xf32> to vector<16x8xf32>
      %109 = arith.mulf %108, %107 : vector<16x8xf32>
      %110 = arith.truncf %100 : vector<16x16xf32> to vector<16x16xbf16>
      %111 = vector.extract_strided_slice %14 {offsets = [0, 16], sizes = [16, 8], strides = [1, 1]} : vector<16x32xbf16> to vector<16x8xbf16>
      %cst_50 = arith.constant dense<0.000000e+00> : vector<16x8xf32>
      %112 = tpu.matmul %110, %111, %cst_50 {dimension_numbers = #tpu.dot_dimension_numbers<[1], [0], [0], [1], [0, 0, 1, 1], [], []>} : vector<16x16xbf16>, vector<16x8xbf16>, vector<16x8xf32> -> vector<16x8xf32>
      %113 = arith.addf %109, %112 : vector<16x8xf32>
      %c0_51 = arith.constant 0 : index
      %c16_52 = arith.constant 16 : index
      %114 = vector.load %arg11[%c0_51, %c16_52] : memref<16x32xf32, #tpu.memory_space<vmem>>, vector<16x8xf32>
      tpu.vector_store %arg11[%c0_51, %c16_52], %113 {strides = array<i32>} : memref<16x32xf32, #tpu.memory_space<vmem>>, vector<16x8xf32>,
      %c0_53 = arith.constant 0 : index
      %c2_54 = arith.constant 2 : index
      %115 = vector.load %arg9[%c0_53, %c2_54] : memref<16x4xf32, #tpu.memory_space<vmem>>, vector<16x1xf32>
      tpu.vector_store %arg9[%c0_53, %c2_54], %95 {strides = array<i32>} : memref<16x4xf32, #tpu.memory_space<vmem>>, vector<16x1xf32>,
      %116 = vector.extract_strided_slice %16 {offsets = [0, 3], sizes = [16, 1], strides = [1, 1]} : vector<16x4xf32> to vector<16x1xf32>
      %117 = vector.extract_strided_slice %15 {offsets = [3, 0], sizes = [1, 16], strides = [1, 1]} : vector<4x16xf32> to vector<1x16xf32>
      %118 = vector.broadcast %116 : vector<16x1xf32> to vector<16x16xf32>
      %119 = vector.broadcast %117 : vector<1x16xf32> to vector<16x16xf32>
      %120 = arith.addf %118, %119 : vector<16x16xf32>
      %cst_55 = arith.constant 2.000000e-01 : f32
      %121 = vector.broadcast %cst_55 : f32 to vector<16x16xf32>
      %122 = arith.mulf %121, %120 : vector<16x16xf32>
      %123 = arith.maximumf %120, %122 : vector<16x16xf32>
      %124 = arith.addf %123, %13 : vector<16x16xf32>
      %c0_56 = arith.constant 0 : index
      %c3 = arith.constant 3 : index
      %125 = vector.load %arg9[%c0_56, %c3] : memref<16x4xf32, #tpu.memory_space<vmem>>, vector<16x1xf32>
      %cst_57 = arith.constant dense<0xFF800000> : vector<16xf32>
      %126 = vector.multi_reduction <maximumf>, %124, %cst_57 [1] : vector<16x16xf32> to vector<16xf32>
      %127 = vector.shape_cast %126 : vector<16xf32> to vector<16x1xf32>
      %128 = arith.maximumf %125, %127 : vector<16x1xf32>
      %129 = arith.subf %125, %128 : vector<16x1xf32>
      %130 = math.exp %129 : vector<16x1xf32>
      %131 = vector.broadcast %128 : vector<16x1xf32> to vector<16x16xf32>
      %132 = arith.subf %124, %131 : vector<16x16xf32>
      %133 = math.exp %132 : vector<16x16xf32>
      %c0_58 = arith.constant 0 : index
      %c3_59 = arith.constant 3 : index
      %134 = vector.load %arg10[%c0_58, %c3_59] : memref<16x4xf32, #tpu.memory_space<vmem>>, vector<16x1xf32>
      %135 = arith.mulf %130, %134 : vector<16x1xf32>
      %cst_60 = arith.constant dense<0.000000e+00> : vector<16xf32>
      %136 = vector.multi_reduction <add>, %133, %cst_60 [1] : vector<16x16xf32> to vector<16xf32>
      %137 = vector.shape_cast %136 : vector<16xf32> to vector<16x1xf32>
      %138 = arith.addf %135, %137 : vector<16x1xf32>
      %c0_61 = arith.constant 0 : index
      %c3_62 = arith.constant 3 : index
      %139 = vector.load %arg10[%c0_61, %c3_62] : memref<16x4xf32, #tpu.memory_space<vmem>>, vector<16x1xf32>
      tpu.vector_store %arg10[%c0_61, %c3_62], %138 {strides = array<i32>} : memref<16x4xf32, #tpu.memory_space<vmem>>, vector<16x1xf32>,
      %c0_63 = arith.constant 0 : index
      %c24 = arith.constant 24 : index
      %140 = vector.load %arg11[%c0_63, %c24] : memref<16x32xf32, #tpu.memory_space<vmem>>, vector<16x8xf32>
      %141 = vector.broadcast %130 : vector<16x1xf32> to vector<16x8xf32>
      %142 = arith.mulf %141, %140 : vector<16x8xf32>
      %143 = arith.truncf %133 : vector<16x16xf32> to vector<16x16xbf16>
      %144 = vector.extract_strided_slice %14 {offsets = [0, 24], sizes = [16, 8], strides = [1, 1]} : vector<16x32xbf16> to vector<16x8xbf16>
      %cst_64 = arith.constant dense<0.000000e+00> : vector<16x8xf32>
      %145 = tpu.matmul %143, %144, %cst_64 {dimension_numbers = #tpu.dot_dimension_numbers<[1], [0], [0], [1], [0, 0, 1, 1], [], []>} : vector<16x16xbf16>, vector<16x8xbf16>, vector<16x8xf32> -> vector<16x8xf32>
      %146 = arith.addf %142, %145 : vector<16x8xf32>
      %c0_65 = arith.constant 0 : index
      %c24_66 = arith.constant 24 : index
      %147 = vector.load %arg11[%c0_65, %c24_66] : memref<16x32xf32, #tpu.memory_space<vmem>>, vector<16x8xf32>
      tpu.vector_store %arg11[%c0_65, %c24_66], %146 {strides = array<i32>} : memref<16x32xf32, #tpu.memory_space<vmem>>, vector<16x8xf32>,
      %c0_67 = arith.constant 0 : index
      %c3_68 = arith.constant 3 : index
      %148 = vector.load %arg9[%c0_67, %c3_68] : memref<16x4xf32, #tpu.memory_space<vmem>>, vector<16x1xf32>
      tpu.vector_store %arg9[%c0_67, %c3_68], %128 {strides = array<i32>} : memref<16x4xf32, #tpu.memory_space<vmem>>, vector<16x1xf32>,
    } else {
    }
    %c0_i32_3 = arith.constant 0 : i32
    %9 = arith.cmpi eq, %arg1, %c0_i32_3 : i32
    %10 = arith.extui %9 : i1 to i32
    %c0_i32_4 = arith.constant 0 : i32
    %11 = arith.cmpi ne, %10, %c0_i32_4 : i32
    scf.if %11 {
      %c0 = arith.constant 0 : index
      %c0_5 = arith.constant 0 : index
      %12 = vector.load %arg11[%c0, %c0_5] : memref<16x32xf32, #tpu.memory_space<vmem>>, vector<16x8xf32>
      %c0_6 = arith.constant 0 : index
      %c0_7 = arith.constant 0 : index
      %13 = vector.load %arg10[%c0_6, %c0_7] : memref<16x4xf32, #tpu.memory_space<vmem>>, vector<16x1xf32>
      %14 = vector.broadcast %13 : vector<16x1xf32> to vector<16x8xf32>
      %15 = arith.divf %12, %14 : vector<16x8xf32>
      %c0_8 = arith.constant 0 : index
      %c8 = arith.constant 8 : index
      %16 = vector.load %arg11[%c0_8, %c8] : memref<16x32xf32, #tpu.memory_space<vmem>>, vector<16x8xf32>
      %c0_9 = arith.constant 0 : index
      %c1 = arith.constant 1 : index
      %17 = vector.load %arg10[%c0_9, %c1] : memref<16x4xf32, #tpu.memory_space<vmem>>, vector<16x1xf32>
      %18 = vector.broadcast %17 : vector<16x1xf32> to vector<16x8xf32>
      %19 = arith.divf %16, %18 : vector<16x8xf32>
      %c0_10 = arith.constant 0 : index
      %c16 = arith.constant 16 : index
      %20 = vector.load %arg11[%c0_10, %c16] : memref<16x32xf32, #tpu.memory_space<vmem>>, vector<16x8xf32>
      %c0_11 = arith.constant 0 : index
      %c2 = arith.constant 2 : index
      %21 = vector.load %arg10[%c0_11, %c2] : memref<16x4xf32, #tpu.memory_space<vmem>>, vector<16x1xf32>
      %22 = vector.broadcast %21 : vector<16x1xf32> to vector<16x8xf32>
      %23 = arith.divf %20, %22 : vector<16x8xf32>
      %c0_12 = arith.constant 0 : index
      %c24 = arith.constant 24 : index
      %24 = vector.load %arg11[%c0_12, %c24] : memref<16x32xf32, #tpu.memory_space<vmem>>, vector<16x8xf32>
      %c0_13 = arith.constant 0 : index
      %c3 = arith.constant 3 : index
      %25 = vector.load %arg10[%c0_13, %c3] : memref<16x4xf32, #tpu.memory_space<vmem>>, vector<16x1xf32>
      %26 = vector.broadcast %25 : vector<16x1xf32> to vector<16x8xf32>
      %27 = arith.divf %24, %26 : vector<16x8xf32>
      %28 = tpu.concatenate %15, %19, %23, %27 in 1 : vector<16x8xf32>, vector<16x8xf32>, vector<16x8xf32>, vector<16x8xf32> -> vector<16x32xf32>
      %c0_14 = arith.constant 0 : index
      %c0_15 = arith.constant 0 : index
      %29 = vector.load %arg7[%c0_14, %c0_15] : memref<1x32xf32, #tpu.memory_space<vmem>>, vector<1x32xf32>
      %30 = vector.broadcast %29 : vector<1x32xf32> to vector<16x32xf32>
      %31 = arith.addf %28, %30 : vector<16x32xf32>
      %cst = arith.constant 0.000000e+00 : f32
      %32 = vector.broadcast %cst : f32 to vector<16x32xf32>
      %33 = arith.maximumf %31, %32 : vector<16x32xf32>
      %34 = arith.truncf %33 : vector<16x32xf32> to vector<16x32xbf16>
      %c0_16 = arith.constant 0 : index
      %c0_17 = arith.constant 0 : index
      %35 = vector.load %arg8[%c0_16, %c0_17] : memref<16x32xbf16, #tpu.memory_space<vmem>>, vector<16x32xbf16>
      tpu.vector_store %arg8[%c0_16, %c0_17], %34 {strides = array<i32>} : memref<16x32xbf16, #tpu.memory_space<vmem>>, vector<16x32xbf16>,
    } else {
    }
    return
  }
  func.func @transform_0(%arg0: i32, %arg1: i32, %arg2: memref<1x1xi32, #tpu.memory_space<smem>>) -> (i32, i32) {
    %c0_i32 = arith.constant 0 : i32
    return %arg0, %arg1 : i32, i32
  }
  func.func @transform_1(%arg0: i32, %arg1: i32, %arg2: memref<1x1xi32, #tpu.memory_space<smem>>) -> (i32, i32) {
    %c0_i32 = arith.constant 0 : i32
    %c0_i32_0 = arith.constant 0 : i32
    return %c0_i32, %arg1 : i32, i32
  }
  func.func @transform_2(%arg0: i32, %arg1: i32, %arg2: memref<1x1xi32, #tpu.memory_space<smem>>) -> (i32, i32) {
    %c0_i32 = arith.constant 0 : i32
    %c0_i32_0 = arith.constant 0 : i32
    return %arg0, %c0_i32 : i32, i32
  }
  func.func @transform_3(%arg0: i32, %arg1: i32, %arg2: memref<1x1xi32, #tpu.memory_space<smem>>) -> (i32, i32) {
    %c0_i32 = arith.constant 0 : i32
    %c0_i32_0 = arith.constant 0 : i32
    return %arg1, %c0_i32 : i32, i32
  }
  func.func @transform_4(%arg0: i32, %arg1: i32, %arg2: memref<1x1xi32, #tpu.memory_space<smem>>) -> (i32, i32) {
    %c0_i32 = arith.constant 0 : i32
    %c0_i32_0 = arith.constant 0 : i32
    %c0_i32_1 = arith.constant 0 : i32
    return %c0_i32, %c0_i32_0 : i32, i32
  }
  func.func @transform_5(%arg0: i32, %arg1: i32, %arg2: memref<1x1xi32, #tpu.memory_space<smem>>) -> (i32, i32) {
    %c0_i32 = arith.constant 0 : i32
    %c0_i32_0 = arith.constant 0 : i32
    return %arg0, %c0_i32 : i32, i32
  }
}

module attributes {stable_mosaic.version = 11 : i64} {
  func.func @gat_attn_kernel(%arg0: i32, %arg1: i32, %arg2: memref<1x1xi32, #tpu.memory_space<smem>>, %arg3: memref<16x16xbf16, #tpu.memory_space<vmem>>, %arg4: memref<4x16xf32, #tpu.memory_space<vmem>>, %arg5: memref<16x4xf32, #tpu.memory_space<vmem>>, %arg6: memref<16x32xbf16, #tpu.memory_space<vmem>>, %arg7: memref<1x32xf32, #tpu.memory_space<vmem>>, %arg8: memref<16x32xf32, #tpu.memory_space<vmem>>, %arg9: memref<16x4xf32, #tpu.memory_space<vmem>>, %arg10: memref<16x4xf32, #tpu.memory_space<vmem>>, %arg11: memref<16x32xf32, #tpu.memory_space<vmem>>) attributes {dimension_semantics = [#tpu.dimension_semantics<parallel>, #tpu.dimension_semantics<arbitrary>], iteration_bounds = array<i64: 1, 1>, scalar_prefetch = 1 : i64, scratch_operands = 3 : i64, tpu.core_type = #tpu.core_type<tc>, window_params = [{transform_indices = @transform_0, window_bounds = array<i64: 16, 16>}, {transform_indices = @transform_1, window_bounds = array<i64: 4, 16>}, {transform_indices = @transform_2, window_bounds = array<i64: 16, 4>}, {transform_indices = @transform_3, window_bounds = array<i64: 16, 32>}, {pipeline_mode = #tpu.pipeline_mode<synchronous>, transform_indices = @transform_4, window_bounds = array<i64: 1, 32>}, {transform_indices = @transform_5, window_bounds = array<i64: 16, 32>}]} {
    %c0_i32 = arith.constant 0 : i32
    %0 = arith.cmpi eq, %arg1, %c0_i32 : i32
    %1 = arith.extui %0 : i1 to i32
    %c0_i32_0 = arith.constant 0 : i32
    %2 = arith.cmpi ne, %1, %c0_i32_0 : i32
    scf.if %2 {
      %cst = arith.constant -1.000000e+30 : f32
      %12 = vector.broadcast %cst : f32 to vector<16x4xf32>
      %c0 = arith.constant 0 : index
      %c0_5 = arith.constant 0 : index
      %13 = vector.load %arg9[%c0, %c0_5] : memref<16x4xf32, #tpu.memory_space<vmem>>, vector<16x4xf32>
      tpu.vector_store %arg9[%c0, %c0_5], %12 {strides = array<i32>} : memref<16x4xf32, #tpu.memory_space<vmem>>, vector<16x4xf32>,
      %cst_6 = arith.constant 0.000000e+00 : f32
      %14 = vector.broadcast %cst_6 : f32 to vector<16x4xf32>
      %c0_7 = arith.constant 0 : index
      %c0_8 = arith.constant 0 : index
      %15 = vector.load %arg10[%c0_7, %c0_8] : memref<16x4xf32, #tpu.memory_space<vmem>>, vector<16x4xf32>
      tpu.vector_store %arg10[%c0_7, %c0_8], %14 {strides = array<i32>} : memref<16x4xf32, #tpu.memory_space<vmem>>, vector<16x4xf32>,
      %cst_9 = arith.constant 0.000000e+00 : f32
      %16 = vector.broadcast %cst_9 : f32 to vector<16x32xf32>
      %c0_10 = arith.constant 0 : index
      %c0_11 = arith.constant 0 : index
      %17 = vector.load %arg11[%c0_10, %c0_11] : memref<16x32xf32, #tpu.memory_space<vmem>>, vector<16x32xf32>
      tpu.vector_store %arg11[%c0_10, %c0_11], %16 {strides = array<i32>} : memref<16x32xf32, #tpu.memory_space<vmem>>, vector<16x32xf32>,
    } else {
    }
    %3 = arith.index_cast %arg0 : i32 to index
    %4 = arith.index_cast %arg1 : i32 to index
    %5 = memref.load %arg2[%3, %4] : memref<1x1xi32, #tpu.memory_space<smem>>
    %c0_i32_1 = arith.constant 0 : i32
    %6 = arith.cmpi sgt, %5, %c0_i32_1 : i32
    %7 = arith.extui %6 : i1 to i32
    %c0_i32_2 = arith.constant 0 : i32
    %8 = arith.cmpi ne, %7, %c0_i32_2 : i32
    scf.if %8 {
      %c0 = arith.constant 0 : index
      %c0_5 = arith.constant 0 : index
      %12 = vector.load %arg3[%c0, %c0_5] : memref<16x16xbf16, #tpu.memory_space<vmem>>, vector<16x16xbf16>
      %13 = arith.extf %12 : vector<16x16xbf16> to vector<16x16xf32>
      %c0_6 = arith.constant 0 : index
      %c0_7 = arith.constant 0 : index
      %14 = vector.load %arg6[%c0_6, %c0_7] : memref<16x32xbf16, #tpu.memory_space<vmem>>, vector<16x32xbf16>
      %c0_8 = arith.constant 0 : index
      %c0_9 = arith.constant 0 : index
      %15 = vector.load %arg4[%c0_8, %c0_9] : memref<4x16xf32, #tpu.memory_space<vmem>>, vector<4x16xf32>
      %c0_10 = arith.constant 0 : index
      %c0_11 = arith.constant 0 : index
      %16 = vector.load %arg5[%c0_10, %c0_11] : memref<16x4xf32, #tpu.memory_space<vmem>>, vector<16x4xf32>
      %17 = vector.extract_strided_slice %16 {offsets = [0, 0], sizes = [16, 1], strides = [1, 1]} : vector<16x4xf32> to vector<16x1xf32>
      %18 = vector.extract_strided_slice %15 {offsets = [0, 0], sizes = [1, 16], strides = [1, 1]} : vector<4x16xf32> to vector<1x16xf32>
      %19 = vector.broadcast %17 : vector<16x1xf32> to vector<16x16xf32>
      %20 = vector.broadcast %18 : vector<1x16xf32> to vector<16x16xf32>
      %21 = arith.addf %19, %20 : vector<16x16xf32>
      %cst = arith.constant 2.000000e-01 : f32
      %22 = vector.broadcast %cst : f32 to vector<16x16xf32>
      %23 = arith.mulf %22, %21 : vector<16x16xf32>
      %24 = arith.maximumf %21, %23 : vector<16x16xf32>
      %25 = arith.addf %24, %13 : vector<16x16xf32>
      %c0_12 = arith.constant 0 : index
      %c0_13 = arith.constant 0 : index
      %26 = vector.load %arg9[%c0_12, %c0_13] : memref<16x4xf32, #tpu.memory_space<vmem>>, vector<16x1xf32>
      %cst_14 = arith.constant dense<0xFF800000> : vector<16xf32>
      %27 = vector.multi_reduction <maximumf>, %25, %cst_14 [1] : vector<16x16xf32> to vector<16xf32>
      %28 = vector.shape_cast %27 : vector<16xf32> to vector<16x1xf32>
      %29 = arith.maximumf %26, %28 : vector<16x1xf32>
      %30 = arith.subf %26, %29 : vector<16x1xf32>
      %31 = math.exp %30 : vector<16x1xf32>
      %32 = vector.broadcast %29 : vector<16x1xf32> to vector<16x16xf32>
      %33 = arith.subf %25, %32 : vector<16x16xf32>
      %34 = math.exp %33 : vector<16x16xf32>
      %c0_15 = arith.constant 0 : index
      %c0_16 = arith.constant 0 : index
      %35 = vector.load %arg10[%c0_15, %c0_16] : memref<16x4xf32, #tpu.memory_space<vmem>>, vector<16x1xf32>
      %36 = arith.mulf %31, %35 : vector<16x1xf32>
      %cst_17 = arith.constant dense<0.000000e+00> : vector<16xf32>
      %37 = vector.multi_reduction <add>, %34, %cst_17 [1] : vector<16x16xf32> to vector<16xf32>
      %38 = vector.shape_cast %37 : vector<16xf32> to vector<16x1xf32>
      %39 = arith.addf %36, %38 : vector<16x1xf32>
      %c0_18 = arith.constant 0 : index
      %c0_19 = arith.constant 0 : index
      %40 = vector.load %arg10[%c0_18, %c0_19] : memref<16x4xf32, #tpu.memory_space<vmem>>, vector<16x1xf32>
      tpu.vector_store %arg10[%c0_18, %c0_19], %39 {strides = array<i32>} : memref<16x4xf32, #tpu.memory_space<vmem>>, vector<16x1xf32>,
      %c0_20 = arith.constant 0 : index
      %c0_21 = arith.constant 0 : index
      %41 = vector.load %arg11[%c0_20, %c0_21] : memref<16x32xf32, #tpu.memory_space<vmem>>, vector<16x8xf32>
      %42 = vector.broadcast %31 : vector<16x1xf32> to vector<16x8xf32>
      %43 = arith.mulf %42, %41 : vector<16x8xf32>
      %44 = arith.truncf %34 : vector<16x16xf32> to vector<16x16xbf16>
      %45 = vector.extract_strided_slice %14 {offsets = [0, 0], sizes = [16, 8], strides = [1, 1]} : vector<16x32xbf16> to vector<16x8xbf16>
      %cst_22 = arith.constant dense<0.000000e+00> : vector<16x8xf32>
      %46 = tpu.matmul %44, %45, %cst_22 {dimension_numbers = #tpu.dot_dimension_numbers<[1], [0], [0], [1], [0, 0, 1, 1], [], []>} : vector<16x16xbf16>, vector<16x8xbf16>, vector<16x8xf32> -> vector<16x8xf32>
      %47 = arith.addf %43, %46 : vector<16x8xf32>
      %c0_23 = arith.constant 0 : index
      %c0_24 = arith.constant 0 : index
      %48 = vector.load %arg11[%c0_23, %c0_24] : memref<16x32xf32, #tpu.memory_space<vmem>>, vector<16x8xf32>
      tpu.vector_store %arg11[%c0_23, %c0_24], %47 {strides = array<i32>} : memref<16x32xf32, #tpu.memory_space<vmem>>, vector<16x8xf32>,
      %c0_25 = arith.constant 0 : index
      %c0_26 = arith.constant 0 : index
      %49 = vector.load %arg9[%c0_25, %c0_26] : memref<16x4xf32, #tpu.memory_space<vmem>>, vector<16x1xf32>
      tpu.vector_store %arg9[%c0_25, %c0_26], %29 {strides = array<i32>} : memref<16x4xf32, #tpu.memory_space<vmem>>, vector<16x1xf32>,
      %50 = vector.extract_strided_slice %16 {offsets = [0, 1], sizes = [16, 1], strides = [1, 1]} : vector<16x4xf32> to vector<16x1xf32>
      %51 = vector.extract_strided_slice %15 {offsets = [1, 0], sizes = [1, 16], strides = [1, 1]} : vector<4x16xf32> to vector<1x16xf32>
      %52 = vector.broadcast %50 : vector<16x1xf32> to vector<16x16xf32>
      %53 = vector.broadcast %51 : vector<1x16xf32> to vector<16x16xf32>
      %54 = arith.addf %52, %53 : vector<16x16xf32>
      %cst_27 = arith.constant 2.000000e-01 : f32
      %55 = vector.broadcast %cst_27 : f32 to vector<16x16xf32>
      %56 = arith.mulf %55, %54 : vector<16x16xf32>
      %57 = arith.maximumf %54, %56 : vector<16x16xf32>
      %58 = arith.addf %57, %13 : vector<16x16xf32>
      %c0_28 = arith.constant 0 : index
      %c1 = arith.constant 1 : index
      %59 = vector.load %arg9[%c0_28, %c1] : memref<16x4xf32, #tpu.memory_space<vmem>>, vector<16x1xf32>
      %cst_29 = arith.constant dense<0xFF800000> : vector<16xf32>
      %60 = vector.multi_reduction <maximumf>, %58, %cst_29 [1] : vector<16x16xf32> to vector<16xf32>
      %61 = vector.shape_cast %60 : vector<16xf32> to vector<16x1xf32>
      %62 = arith.maximumf %59, %61 : vector<16x1xf32>
      %63 = arith.subf %59, %62 : vector<16x1xf32>
      %64 = math.exp %63 : vector<16x1xf32>
      %65 = vector.broadcast %62 : vector<16x1xf32> to vector<16x16xf32>
      %66 = arith.subf %58, %65 : vector<16x16xf32>
      %67 = math.exp %66 : vector<16x16xf32>
      %c0_30 = arith.constant 0 : index
      %c1_31 = arith.constant 1 : index
      %68 = vector.load %arg10[%c0_30, %c1_31] : memref<16x4xf32, #tpu.memory_space<vmem>>, vector<16x1xf32>
      %69 = arith.mulf %64, %68 : vector<16x1xf32>
      %cst_32 = arith.constant dense<0.000000e+00> : vector<16xf32>
      %70 = vector.multi_reduction <add>, %67, %cst_32 [1] : vector<16x16xf32> to vector<16xf32>
      %71 = vector.shape_cast %70 : vector<16xf32> to vector<16x1xf32>
      %72 = arith.addf %69, %71 : vector<16x1xf32>
      %c0_33 = arith.constant 0 : index
      %c1_34 = arith.constant 1 : index
      %73 = vector.load %arg10[%c0_33, %c1_34] : memref<16x4xf32, #tpu.memory_space<vmem>>, vector<16x1xf32>
      tpu.vector_store %arg10[%c0_33, %c1_34], %72 {strides = array<i32>} : memref<16x4xf32, #tpu.memory_space<vmem>>, vector<16x1xf32>,
      %c0_35 = arith.constant 0 : index
      %c8 = arith.constant 8 : index
      %74 = vector.load %arg11[%c0_35, %c8] : memref<16x32xf32, #tpu.memory_space<vmem>>, vector<16x8xf32>
      %75 = vector.broadcast %64 : vector<16x1xf32> to vector<16x8xf32>
      %76 = arith.mulf %75, %74 : vector<16x8xf32>
      %77 = arith.truncf %67 : vector<16x16xf32> to vector<16x16xbf16>
      %78 = vector.extract_strided_slice %14 {offsets = [0, 8], sizes = [16, 8], strides = [1, 1]} : vector<16x32xbf16> to vector<16x8xbf16>
      %cst_36 = arith.constant dense<0.000000e+00> : vector<16x8xf32>
      %79 = tpu.matmul %77, %78, %cst_36 {dimension_numbers = #tpu.dot_dimension_numbers<[1], [0], [0], [1], [0, 0, 1, 1], [], []>} : vector<16x16xbf16>, vector<16x8xbf16>, vector<16x8xf32> -> vector<16x8xf32>
      %80 = arith.addf %76, %79 : vector<16x8xf32>
      %c0_37 = arith.constant 0 : index
      %c8_38 = arith.constant 8 : index
      %81 = vector.load %arg11[%c0_37, %c8_38] : memref<16x32xf32, #tpu.memory_space<vmem>>, vector<16x8xf32>
      tpu.vector_store %arg11[%c0_37, %c8_38], %80 {strides = array<i32>} : memref<16x32xf32, #tpu.memory_space<vmem>>, vector<16x8xf32>,
      %c0_39 = arith.constant 0 : index
      %c1_40 = arith.constant 1 : index
      %82 = vector.load %arg9[%c0_39, %c1_40] : memref<16x4xf32, #tpu.memory_space<vmem>>, vector<16x1xf32>
      tpu.vector_store %arg9[%c0_39, %c1_40], %62 {strides = array<i32>} : memref<16x4xf32, #tpu.memory_space<vmem>>, vector<16x1xf32>,
      %83 = vector.extract_strided_slice %16 {offsets = [0, 2], sizes = [16, 1], strides = [1, 1]} : vector<16x4xf32> to vector<16x1xf32>
      %84 = vector.extract_strided_slice %15 {offsets = [2, 0], sizes = [1, 16], strides = [1, 1]} : vector<4x16xf32> to vector<1x16xf32>
      %85 = vector.broadcast %83 : vector<16x1xf32> to vector<16x16xf32>
      %86 = vector.broadcast %84 : vector<1x16xf32> to vector<16x16xf32>
      %87 = arith.addf %85, %86 : vector<16x16xf32>
      %cst_41 = arith.constant 2.000000e-01 : f32
      %88 = vector.broadcast %cst_41 : f32 to vector<16x16xf32>
      %89 = arith.mulf %88, %87 : vector<16x16xf32>
      %90 = arith.maximumf %87, %89 : vector<16x16xf32>
      %91 = arith.addf %90, %13 : vector<16x16xf32>
      %c0_42 = arith.constant 0 : index
      %c2 = arith.constant 2 : index
      %92 = vector.load %arg9[%c0_42, %c2] : memref<16x4xf32, #tpu.memory_space<vmem>>, vector<16x1xf32>
      %cst_43 = arith.constant dense<0xFF800000> : vector<16xf32>
      %93 = vector.multi_reduction <maximumf>, %91, %cst_43 [1] : vector<16x16xf32> to vector<16xf32>
      %94 = vector.shape_cast %93 : vector<16xf32> to vector<16x1xf32>
      %95 = arith.maximumf %92, %94 : vector<16x1xf32>
      %96 = arith.subf %92, %95 : vector<16x1xf32>
      %97 = math.exp %96 : vector<16x1xf32>
      %98 = vector.broadcast %95 : vector<16x1xf32> to vector<16x16xf32>
      %99 = arith.subf %91, %98 : vector<16x16xf32>
      %100 = math.exp %99 : vector<16x16xf32>
      %c0_44 = arith.constant 0 : index
      %c2_45 = arith.constant 2 : index
      %101 = vector.load %arg10[%c0_44, %c2_45] : memref<16x4xf32, #tpu.memory_space<vmem>>, vector<16x1xf32>
      %102 = arith.mulf %97, %101 : vector<16x1xf32>
      %cst_46 = arith.constant dense<0.000000e+00> : vector<16xf32>
      %103 = vector.multi_reduction <add>, %100, %cst_46 [1] : vector<16x16xf32> to vector<16xf32>
      %104 = vector.shape_cast %103 : vector<16xf32> to vector<16x1xf32>
      %105 = arith.addf %102, %104 : vector<16x1xf32>
      %c0_47 = arith.constant 0 : index
      %c2_48 = arith.constant 2 : index
      %106 = vector.load %arg10[%c0_47, %c2_48] : memref<16x4xf32, #tpu.memory_space<vmem>>, vector<16x1xf32>
      tpu.vector_store %arg10[%c0_47, %c2_48], %105 {strides = array<i32>} : memref<16x4xf32, #tpu.memory_space<vmem>>, vector<16x1xf32>,
      %c0_49 = arith.constant 0 : index
      %c16 = arith.constant 16 : index
      %107 = vector.load %arg11[%c0_49, %c16] : memref<16x32xf32, #tpu.memory_space<vmem>>, vector<16x8xf32>
      %108 = vector.broadcast %97 : vector<16x1xf32> to vector<16x8xf32>
      %109 = arith.mulf %108, %107 : vector<16x8xf32>
      %110 = arith.truncf %100 : vector<16x16xf32> to vector<16x16xbf16>
      %111 = vector.extract_strided_slice %14 {offsets = [0, 16], sizes = [16, 8], strides = [1, 1]} : vector<16x32xbf16> to vector<16x8xbf16>
      %cst_50 = arith.constant dense<0.000000e+00> : vector<16x8xf32>
      %112 = tpu.matmul %110, %111, %cst_50 {dimension_numbers = #tpu.dot_dimension_numbers<[1], [0], [0], [1], [0, 0, 1, 1], [], []>} : vector<16x16xbf16>, vector<16x8xbf16>, vector<16x8xf32> -> vector<16x8xf32>
      %113 = arith.addf %109, %112 : vector<16x8xf32>
      %c0_51 = arith.constant 0 : index
      %c16_52 = arith.constant 16 : index
      %114 = vector.load %arg11[%c0_51, %c16_52] : memref<16x32xf32, #tpu.memory_space<vmem>>, vector<16x8xf32>
      tpu.vector_store %arg11[%c0_51, %c16_52], %113 {strides = array<i32>} : memref<16x32xf32, #tpu.memory_space<vmem>>, vector<16x8xf32>,
      %c0_53 = arith.constant 0 : index
      %c2_54 = arith.constant 2 : index
      %115 = vector.load %arg9[%c0_53, %c2_54] : memref<16x4xf32, #tpu.memory_space<vmem>>, vector<16x1xf32>
      tpu.vector_store %arg9[%c0_53, %c2_54], %95 {strides = array<i32>} : memref<16x4xf32, #tpu.memory_space<vmem>>, vector<16x1xf32>,
      %116 = vector.extract_strided_slice %16 {offsets = [0, 3], sizes = [16, 1], strides = [1, 1]} : vector<16x4xf32> to vector<16x1xf32>
      %117 = vector.extract_strided_slice %15 {offsets = [3, 0], sizes = [1, 16], strides = [1, 1]} : vector<4x16xf32> to vector<1x16xf32>
      %118 = vector.broadcast %116 : vector<16x1xf32> to vector<16x16xf32>
      %119 = vector.broadcast %117 : vector<1x16xf32> to vector<16x16xf32>
      %120 = arith.addf %118, %119 : vector<16x16xf32>
      %cst_55 = arith.constant 2.000000e-01 : f32
      %121 = vector.broadcast %cst_55 : f32 to vector<16x16xf32>
      %122 = arith.mulf %121, %120 : vector<16x16xf32>
      %123 = arith.maximumf %120, %122 : vector<16x16xf32>
      %124 = arith.addf %123, %13 : vector<16x16xf32>
      %c0_56 = arith.constant 0 : index
      %c3 = arith.constant 3 : index
      %125 = vector.load %arg9[%c0_56, %c3] : memref<16x4xf32, #tpu.memory_space<vmem>>, vector<16x1xf32>
      %cst_57 = arith.constant dense<0xFF800000> : vector<16xf32>
      %126 = vector.multi_reduction <maximumf>, %124, %cst_57 [1] : vector<16x16xf32> to vector<16xf32>
      %127 = vector.shape_cast %126 : vector<16xf32> to vector<16x1xf32>
      %128 = arith.maximumf %125, %127 : vector<16x1xf32>
      %129 = arith.subf %125, %128 : vector<16x1xf32>
      %130 = math.exp %129 : vector<16x1xf32>
      %131 = vector.broadcast %128 : vector<16x1xf32> to vector<16x16xf32>
      %132 = arith.subf %124, %131 : vector<16x16xf32>
      %133 = math.exp %132 : vector<16x16xf32>
      %c0_58 = arith.constant 0 : index
      %c3_59 = arith.constant 3 : index
      %134 = vector.load %arg10[%c0_58, %c3_59] : memref<16x4xf32, #tpu.memory_space<vmem>>, vector<16x1xf32>
      %135 = arith.mulf %130, %134 : vector<16x1xf32>
      %cst_60 = arith.constant dense<0.000000e+00> : vector<16xf32>
      %136 = vector.multi_reduction <add>, %133, %cst_60 [1] : vector<16x16xf32> to vector<16xf32>
      %137 = vector.shape_cast %136 : vector<16xf32> to vector<16x1xf32>
      %138 = arith.addf %135, %137 : vector<16x1xf32>
      %c0_61 = arith.constant 0 : index
      %c3_62 = arith.constant 3 : index
      %139 = vector.load %arg10[%c0_61, %c3_62] : memref<16x4xf32, #tpu.memory_space<vmem>>, vector<16x1xf32>
      tpu.vector_store %arg10[%c0_61, %c3_62], %138 {strides = array<i32>} : memref<16x4xf32, #tpu.memory_space<vmem>>, vector<16x1xf32>,
      %c0_63 = arith.constant 0 : index
      %c24 = arith.constant 24 : index
      %140 = vector.load %arg11[%c0_63, %c24] : memref<16x32xf32, #tpu.memory_space<vmem>>, vector<16x8xf32>
      %141 = vector.broadcast %130 : vector<16x1xf32> to vector<16x8xf32>
      %142 = arith.mulf %141, %140 : vector<16x8xf32>
      %143 = arith.truncf %133 : vector<16x16xf32> to vector<16x16xbf16>
      %144 = vector.extract_strided_slice %14 {offsets = [0, 24], sizes = [16, 8], strides = [1, 1]} : vector<16x32xbf16> to vector<16x8xbf16>
      %cst_64 = arith.constant dense<0.000000e+00> : vector<16x8xf32>
      %145 = tpu.matmul %143, %144, %cst_64 {dimension_numbers = #tpu.dot_dimension_numbers<[1], [0], [0], [1], [0, 0, 1, 1], [], []>} : vector<16x16xbf16>, vector<16x8xbf16>, vector<16x8xf32> -> vector<16x8xf32>
      %146 = arith.addf %142, %145 : vector<16x8xf32>
      %c0_65 = arith.constant 0 : index
      %c24_66 = arith.constant 24 : index
      %147 = vector.load %arg11[%c0_65, %c24_66] : memref<16x32xf32, #tpu.memory_space<vmem>>, vector<16x8xf32>
      tpu.vector_store %arg11[%c0_65, %c24_66], %146 {strides = array<i32>} : memref<16x32xf32, #tpu.memory_space<vmem>>, vector<16x8xf32>,
      %c0_67 = arith.constant 0 : index
      %c3_68 = arith.constant 3 : index
      %148 = vector.load %arg9[%c0_67, %c3_68] : memref<16x4xf32, #tpu.memory_space<vmem>>, vector<16x1xf32>
      tpu.vector_store %arg9[%c0_67, %c3_68], %128 {strides = array<i32>} : memref<16x4xf32, #tpu.memory_space<vmem>>, vector<16x1xf32>,
    } else {
    }
    %c0_i32_3 = arith.constant 0 : i32
    %9 = arith.cmpi eq, %arg1, %c0_i32_3 : i32
    %10 = arith.extui %9 : i1 to i32
    %c0_i32_4 = arith.constant 0 : i32
    %11 = arith.cmpi ne, %10, %c0_i32_4 : i32
    scf.if %11 {
      %c0 = arith.constant 0 : index
      %c0_5 = arith.constant 0 : index
      %12 = vector.load %arg11[%c0, %c0_5] : memref<16x32xf32, #tpu.memory_space<vmem>>, vector<16x8xf32>
      %c0_6 = arith.constant 0 : index
      %c0_7 = arith.constant 0 : index
      %13 = vector.load %arg10[%c0_6, %c0_7] : memref<16x4xf32, #tpu.memory_space<vmem>>, vector<16x1xf32>
      %14 = vector.broadcast %13 : vector<16x1xf32> to vector<16x8xf32>
      %15 = arith.divf %12, %14 : vector<16x8xf32>
      %c0_8 = arith.constant 0 : index
      %c8 = arith.constant 8 : index
      %16 = vector.load %arg11[%c0_8, %c8] : memref<16x32xf32, #tpu.memory_space<vmem>>, vector<16x8xf32>
      %c0_9 = arith.constant 0 : index
      %c1 = arith.constant 1 : index
      %17 = vector.load %arg10[%c0_9, %c1] : memref<16x4xf32, #tpu.memory_space<vmem>>, vector<16x1xf32>
      %18 = vector.broadcast %17 : vector<16x1xf32> to vector<16x8xf32>
      %19 = arith.divf %16, %18 : vector<16x8xf32>
      %c0_10 = arith.constant 0 : index
      %c16 = arith.constant 16 : index
      %20 = vector.load %arg11[%c0_10, %c16] : memref<16x32xf32, #tpu.memory_space<vmem>>, vector<16x8xf32>
      %c0_11 = arith.constant 0 : index
      %c2 = arith.constant 2 : index
      %21 = vector.load %arg10[%c0_11, %c2] : memref<16x4xf32, #tpu.memory_space<vmem>>, vector<16x1xf32>
      %22 = vector.broadcast %21 : vector<16x1xf32> to vector<16x8xf32>
      %23 = arith.divf %20, %22 : vector<16x8xf32>
      %c0_12 = arith.constant 0 : index
      %c24 = arith.constant 24 : index
      %24 = vector.load %arg11[%c0_12, %c24] : memref<16x32xf32, #tpu.memory_space<vmem>>, vector<16x8xf32>
      %c0_13 = arith.constant 0 : index
      %c3 = arith.constant 3 : index
      %25 = vector.load %arg10[%c0_13, %c3] : memref<16x4xf32, #tpu.memory_space<vmem>>, vector<16x1xf32>
      %26 = vector.broadcast %25 : vector<16x1xf32> to vector<16x8xf32>
      %27 = arith.divf %24, %26 : vector<16x8xf32>
      %28 = tpu.concatenate %15, %19, %23, %27 in 1 : vector<16x8xf32>, vector<16x8xf32>, vector<16x8xf32>, vector<16x8xf32> -> vector<16x32xf32>
      %c0_14 = arith.constant 0 : index
      %c0_15 = arith.constant 0 : index
      %29 = vector.load %arg7[%c0_14, %c0_15] : memref<1x32xf32, #tpu.memory_space<vmem>>, vector<1x32xf32>
      %30 = vector.broadcast %29 : vector<1x32xf32> to vector<16x32xf32>
      %31 = arith.addf %28, %30 : vector<16x32xf32>
      %cst = arith.constant 0.000000e+00 : f32
      %32 = vector.broadcast %cst : f32 to vector<16x32xf32>
      %33 = arith.maximumf %31, %32 : vector<16x32xf32>
      %c0_16 = arith.constant 0 : index
      %c0_17 = arith.constant 0 : index
      %34 = vector.load %arg8[%c0_16, %c0_17] : memref<16x32xf32, #tpu.memory_space<vmem>>, vector<16x32xf32>
      tpu.vector_store %arg8[%c0_16, %c0_17], %33 {strides = array<i32>} : memref<16x32xf32, #tpu.memory_space<vmem>>, vector<16x32xf32>,
    } else {
    }
    return
  }
  func.func @transform_0(%arg0: i32, %arg1: i32, %arg2: memref<1x1xi32, #tpu.memory_space<smem>>) -> (i32, i32) {
    %c0_i32 = arith.constant 0 : i32
    return %arg0, %arg1 : i32, i32
  }
  func.func @transform_1(%arg0: i32, %arg1: i32, %arg2: memref<1x1xi32, #tpu.memory_space<smem>>) -> (i32, i32) {
    %c0_i32 = arith.constant 0 : i32
    %c0_i32_0 = arith.constant 0 : i32
    return %c0_i32, %arg1 : i32, i32
  }
  func.func @transform_2(%arg0: i32, %arg1: i32, %arg2: memref<1x1xi32, #tpu.memory_space<smem>>) -> (i32, i32) {
    %c0_i32 = arith.constant 0 : i32
    %c0_i32_0 = arith.constant 0 : i32
    return %arg0, %c0_i32 : i32, i32
  }
  func.func @transform_3(%arg0: i32, %arg1: i32, %arg2: memref<1x1xi32, #tpu.memory_space<smem>>) -> (i32, i32) {
    %c0_i32 = arith.constant 0 : i32
    %c0_i32_0 = arith.constant 0 : i32
    return %arg1, %c0_i32 : i32, i32
  }
  func.func @transform_4(%arg0: i32, %arg1: i32, %arg2: memref<1x1xi32, #tpu.memory_space<smem>>) -> (i32, i32) {
    %c0_i32 = arith.constant 0 : i32
    %c0_i32_0 = arith.constant 0 : i32
    %c0_i32_1 = arith.constant 0 : i32
    return %c0_i32, %c0_i32_0 : i32, i32
  }
  func.func @transform_5(%arg0: i32, %arg1: i32, %arg2: memref<1x1xi32, #tpu.memory_space<smem>>) -> (i32, i32) {
    %c0_i32 = arith.constant 0 : i32
    %c0_i32_0 = arith.constant 0 : i32
    return %arg0, %c0_i32 : i32, i32
  }
}

</mosaic_0001>

<bundles_post_ra>
// kernel: gat_model_forward.4
= control target key start
LH: loop header
LB: loop body
LE: loop exit
PB: predicated region body
PF: predicated region fallthrough
CT: control target
= control target key end

     0   :  { %vm29_vm0 = vcmask 1043456   ;;  %v189_v0 = vmov 0.0   ;;  %vm190_vm1 = vmmov 0   ;;  %vm25_vm2 = vcmask 64512   ;;  %s243_s1 = inlined_call_operand.vmem [shape: bf16[8,32], index: 1, kind: input, shape index: {}]   ;;  %s244_s0 = inlined_call_operand.vmem [shape: bf16[16,8], index: 0, kind: input, shape index: {}]   ;;  %s245_s2 = inlined_call_operand.vmem [shape: bf16[32,8], index: 2, kind: input, shape index: {}]   ;;  %s246_s3 = inlined_call_operand.vmem [shape: bf16[16,32], index: 3, kind: output, shape index: {0}]   ;;  %s247_s4 = inlined_call_operand.vmem [shape: f32[16,8], index: 4, kind: output, shape index: {1}]  }
   0x1   :  { %170 = vmatprep.subr.bf16.mxu0 %v189_v0  ;;  %v19_v1 = vld [vmem:[%s243_s1] sm:$0xf]  ;;  %172 = vmatprep.mubr.msk.bf16.mxu0 %vm190_vm1, %v189_v0  ;;  %v188_v5 = vld [vmem:[%s245_s2 + $0x8] sm:$0xff]   ;;  %vm145_vm3 = vcmask 257024   ;;  %vm91_vm4 = vcmask 261120  }
   0x2   :  { %v31_v2 = vsel %vm29_vm0, %v19_v1, 0  ;;  %v186_v3 = vld [vmem:[%s244_s0] sm:$0xff]   ;;  %176 = vmatprep.subr.bf16.mxu1 %v189_v0  ;;  %180 = vmatprep.mubr.msk.bf16.mxu1 %vm190_vm1, %v189_v0 }
   0x3   :  { %171 = vmatpush3.bf16.msra.mxu0 %v31_v2  ;;  %v187_v4 = vld [vmem:[%s245_s2] sm:$0xff]  }
   0x4   :  { %177 = vmatpush3.bf16.msra.mxu1 %v187_v4 }
   0x5   :  { %178 = vmatprep.subr.bf16.mxu1 %v189_v0 }
   0x6   :  { %173 = vmatmul.mubr.msk.bf16.vlgmr.msra.gmra.mrb[0].mxu0 %vm25_vm2, %v186_v3 }
   0x8   :  { %179 = vmatpush3.bf16.msra.mxu1 %v188_v5 }
  0xd9   :  { %v67_v6 = vpop.f32.mrb[0].mxu0 }
  0xda   :  { %v163_v7 = vpack.c.bf16 %v67_v6, %v67_v6  ;;  %v174_v8 = vpop.f32.mrb[1].mxu0 }
  0xdb   :  { %v70_v9 = vpop.f32.mrb[2].mxu0 }
  0xdc   :  { %146 = vst.msk [vmem:[%s246_s3] sm:$0xf] %vm145_vm3, %v163_v7  ;;  %v74_v10 = vpack.c.bf16 %v70_v9, %v67_v6  ;;  %v164_v11 = vpack.c.bf16 %v70_v9, %v70_v9  ;;  %v175_v12 = vpop.f32.mrb[3].mxu0 }
  0xde   :  { %147 = vst.msk [vmem:[%s246_s3 + $0x4] sm:$0xf] %vm145_vm3, %v164_v11  ;;  %181 = vmatmul.mubr.msk.bf16.vlgmr.msra.gmra.mrb[0].mxu1 %vm91_vm4, %v74_v10 }
 0x1b1   :  { %v129_v13 = vpop.f32.mrb[0].mxu1 }
 0x1b2   :  { %136 = vst.msk [vmem:[%s247_s4] sm:$0xff] %vm25_vm2, %v129_v13  ;;  %v182_v14 = vpop.f32.mrb[1].mxu1 }
 0x1b3   :  { %v132_v15 = vpop.f32.mrb[2].mxu1 }
 0x1b4   :  { %137 = vst.msk [vmem:[%s247_s4 + $0x8] sm:$0xff] %vm25_vm2, %v132_v15  ;;  %v183_v16 = vpop.f32.mrb[3].mxu1 }

// kernel: gat_model_forward.6
= control target key start
LH: loop header
LB: loop body
LE: loop exit
PB: predicated region body
PF: predicated region fallthrough
CT: control target
= control target key end

     0   :  { %v207_v0 = vmov 0.0   ;;  %vm208_vm0 = vmmov 0   ;;  %vm40_vm1 = vcmask 261120   ;;  %vm156_vm2 = vcmask 257024   ;;  %s263_s1 = inlined_call_operand.vmem [shape: bf16[32,32], index: 1, kind: input, shape index: {}]   ;;  %s264_s2 = inlined_call_operand.vmem [shape: bf16[32,8], index: 2, kind: input, shape index: {}]   ;;  %s265_s0 = inlined_call_operand.vmem [shape: bf16[16,32], index: 0, kind: input, shape index: {}]   ;;  %s266_s3 = inlined_call_operand.vmem [shape: bf16[16,32], index: 3, kind: output, shape index: {0}]   ;;  %s267_s4 = inlined_call_operand.vmem [shape: f32[16,8], index: 4, kind: output, shape index: {1}]  }
   0x1   :  { %184 = vmatprep.subr.bf16.mxu0 %v207_v0  ;;  %v202_v1 = vld [vmem:[%s263_s1] sm:$0xff]   ;;  %188 = vmatprep.mubr.msk.bf16.mxu0 %vm208_vm0, %v207_v0  ;;  %v203_v2 = vld [vmem:[%s263_s1 + $0x8] sm:$0xff]   ;;  %vm146_vm3 = vcmask 64512  }
   0x2   :  { %192 = vmatprep.subr.bf16.mxu1 %v207_v0  ;;  %196 = vmatprep.mubr.msk.bf16.mxu1 %vm208_vm0, %v207_v0  ;;  %v205_v3 = vld [vmem:[%s264_s2] sm:$0xff]   ;;  %v206_v5 = vld [vmem:[%s264_s2 + $0x8] sm:$0xff]  }
   0x3   :  { %185 = vmatpush3.bf16.msra.mxu0 %v202_v1  ;;  %v204_v4 = vld [vmem:[%s265_s0] sm:$0xff]   ;;  %193 = vmatpush3.bf16.msra.mxu1 %v205_v3 }
   0x4   :  { %186 = vmatprep.subr.bf16.mxu0 %v207_v0  ;;  %194 = vmatprep.subr.bf16.mxu1 %v207_v0 }
   0x7   :  { %187 = vmatpush3.bf16.msra.mxu0 %v203_v2  ;;  %195 = vmatpush3.bf16.msra.mxu1 %v206_v5 }
   0xa   :  { %189 = vmatmul.mubr.msk.bf16.vlgmr.msra.gmra.mrb[0].mxu0 %vm40_vm1, %v204_v4 }
  0xdd   :  { %v78_v6 = vpop.f32.mrb[0].mxu0 }
  0xde   :  { %v176_v7 = vpack.c.bf16 %v78_v6, %v78_v6  ;;  %v190_v8 = vpop.f32.mrb[1].mxu0 }
  0xdf   :  { %v81_v9 = vpop.f32.mrb[2].mxu0 }
  0xe0   :  { %157 = vst.msk [vmem:[%s266_s3] sm:$0xf] %vm156_vm2, %v176_v7  ;;  %v85_v10 = vpack.c.bf16 %v81_v9, %v78_v6  ;;  %v177_v11 = vpack.c.bf16 %v81_v9, %v81_v9  ;;  %v191_v12 = vpop.f32.mrb[3].mxu0 }
  0xe2   :  { %158 = vst.msk [vmem:[%s266_s3 + $0x4] sm:$0xf] %vm156_vm2, %v177_v11  ;;  %197 = vmatmul.mubr.msk.bf16.vlgmr.msra.gmra.mrb[0].mxu1 %vm40_vm1, %v85_v10 }
 0x1b5   :  { %v139_v13 = vpop.f32.mrb[0].mxu1 }
 0x1b6   :  { %147 = vst.msk [vmem:[%s267_s4] sm:$0xff] %vm146_vm3, %v139_v13  ;;  %v198_v14 = vpop.f32.mrb[1].mxu1 }
 0x1b7   :  { %v142_v15 = vpop.f32.mrb[2].mxu1 }
 0x1b8   :  { %148 = vst.msk [vmem:[%s267_s4 + $0x8] sm:$0xff] %vm146_vm3, %v142_v15  ;;  %v199_v16 = vpop.f32.mrb[3].mxu1 }

// kernel: gat_model_forward.5
= control target key start
LH: loop header
LB: loop body
LE: loop exit
PB: predicated region body
PF: predicated region fallthrough
CT: control target
= control target key end

     0   :  { %vm27_vm0 = vcmask 31744   ;;  %vm32_vm1 = vcmask 261120   ;;  %v856_v0 = vmov -1e+30   ;;  %v857_v1 = vmov 0.0   ;;  %s1107_s0 = inlined_call_operand.<no memory space> [shape: s32[1,1], index: 0, kind: input, shape index: {}]   ;;  %s1108_s1 = inlined_call_operand.vmem [shape: bf16[16,16], index: 1, kind: input, shape index: {}]   ;;  %s1109_s2 = inlined_call_operand.vmem [shape: f32[4,16], index: 2, kind: input, shape index: {}]   ;;  %s1110_s3 = inlined_call_operand.vmem [shape: f32[16,4], index: 3, kind: input, shape index: {}]   ;;  %s1111_s4 = inlined_call_operand.vmem [shape: bf16[16,32], index: 4, kind: input, shape index: {}]   ;;  %s1112_s5 = inlined_call_operand.vmem [shape: f32[1,32], index: 5, kind: input, shape index: {}]   ;;  %s1113_s6 = inlined_call_operand.vmem [shape: bf16[16,32], index: 6, kind: output, shape index: {}]  }
   0x1   :  { %28 = vst.msk [vmem:[#allocation2] sm:$0xff] %vm27_vm0, %v856_v0  ;;  %29 = vst.msk [vmem:[#allocation2 + $0x8] sm:$0xff] %vm27_vm0, %v856_v0  ;;  %p718_p0 = scmp.le.s32.totalorder %s1107_s0, 0 }
   0x2   :  { %30 = vst.msk [vmem:[#allocation3] sm:$0xff] %vm27_vm0, %v857_v1  ;;  %31 = vst.msk [vmem:[#allocation3 + $0x8] sm:$0xff] %vm27_vm0, %v857_v1  ;;  %v50_v2 = vld [vmem:[%s1110_s3] sm:$0xff] (!%p718_p0)  ;;  %v858_v3 = vmov (!%p718_p0), 0   ;;  %v859_v4 = vmov (!%p718_p0), 1   ;;  %v51_v5 = vld [vmem:[%s1110_s3 + $0x8] sm:$0xff] (!%p718_p0)  ;;  %v62_v8 = vlaneseq (!%p718_p0) }
   0x3   :  { %33 = vst.msk [vmem:[#allocation4] sm:$0xff] %vm32_vm1, %v857_v1  ;;  %34 = vst.msk [vmem:[#allocation4 + $0x8] sm:$0xff] %vm32_vm1, %v857_v1  ;;  %42 = sbr.rel (%p718_p0) target bundleno = 841 (0x349), region = 29  ;;  %783 = vset.pattern.permute.xlu0 (!%p718_p0), %v858_v3  ;;  %784 = vset.pattern.permute.xlu1 (!%p718_p0), %v859_v4  ;;  %v860_v6 = vmov (!%p718_p0), 2   ;;  %v861_v7 = vmov (!%p718_p0), 3   ;;  %v730_v17 = vld [vmem:[%s1108_s1] sm:$0xff] (!%p718_p0)  }
   0x4   :  { %54 = vperm.xlu0 (!%p718_p0), %783, %v50_v2   ;;  %195 = vperm.xlu1 (!%p718_p0), %784, %v50_v2   ;;  %v63_v9 = vshrl.u32 (!%p718_p0), %v62_v8, 7  ;;  %v49_v12 = vld [vmem:[%s1109_s2] sm:$0xf] (!%p718_p0)  ;;  %v731_v23 = vunpack.c.l.bf16 (!%p718_p0), %v730_v17  ;;  %vm76_vm2 = vcmask (!%p718_p0), 130048   ;;  %v732_v30 = vunpack.c.h.bf16 (!%p718_p0), %v730_v17  ;;  %s862_s29 = smov (!%p718_p0), 104   ;;  %s866_s30 = smov (!%p718_p0), 112  }
   0x5   :  { %vm119_vm3 = vcmask (!%p718_p0), 7168   ;;  %vm258_vm4 = vcmask (!%p718_p0), 15368   ;;  %vm402_vm5 = vcmask (!%p718_p0), 23568   ;;  %vm546_vm6 = vcmask (!%p718_p0), 31768   ;;  %s867_s7 = smov (!%p718_p0), 8   ;;  %s868_s8 = smov (!%p718_p0), 16  }
   0x6   :  { %v64_v10 = vsub.s32 (!%p718_p0), 0, %v63_v9  ;;  %v204_v11 = vsub.s32 (!%p718_p0), 1, %v63_v9  ;;  %v348_v20 = vsub.s32 (!%p718_p0), 2, %v63_v9  ;;  %v492_v32 = vsub.s32 (!%p718_p0), 3, %v63_v9  ;;  %s869_s9 = smov (!%p718_p0), 24  }
   0x7   :  { %vm865_vm7 = vmmov (!%p718_p0), 0   ;;  %vm189_vm8 = vcmask (!%p718_p0), 64512   ;;  %vm333_vm9 = vcmask (!%p718_p0), 130112   ;;  %vm477_vm10 = vcmask (!%p718_p0), 195712  }
   0x8   :  { %59 = vperm.xlu0 (!%p718_p0), %783, %v51_v5   ;;  %199 = vperm.xlu1 (!%p718_p0), %784, %v51_v5   ;;  %v65_v13 = vrot.slane (!%p718_p0), %v49_v12, %v64_v10  ;;  %v205_v14 = vrot.slane (!%p718_p0), %v49_v12, %v204_v11  ;;  %v349_v31 = vrot.slane (!%p718_p0), %v49_v12, %v348_v20  ;;  %v74_v10 = vld [vmem:[#allocation2] sm:$0xff] (!%p718_p0)  ;;  %vm621_vm11 = vcmask (!%p718_p0), 261312  }
   0x9   :  { %v493_v47 = vrot.slane (!%p718_p0), %v49_v12, %v492_v32 }
   0xc   :  { %785 = vset.pattern.permute.xlu0 %v860_v6  ;;  %786 = vset.pattern.permute.xlu1 %v860_v6 }
   0xd   :  { %339 = vperm.xlu0 %785, %v50_v2   ;;  %343 = vperm.xlu1 %786, %v51_v5  }
  0x11   :  { %787 = vset.pattern.permute.xlu1 %v861_v7  ;;  %788 = vset.pattern.permute.xlu0 %v861_v7 }
  0x12   :  { %483 = vperm.xlu1 %787, %v50_v2   ;;  %487 = vperm.xlu0 %788, %v51_v5  }
  0x16   :  { %789 = vset.pattern.permute.xlu1 %v859_v4  ;;  %790 = vset.pattern.permute.xlu0 %v859_v4 }
  0x83   :  { %v55_v15 = vpop.permute.xlu0 %54  ;;  %v196_v16 = vpop.permute.xlu1 %195 }
  0x84   :  { %v66_v18 = vadd.f32 %v65_v13, %v55_v15  ;;  %v206_v19 = vadd.f32 %v205_v14, %v196_v16 }
  0x86   :  { %v68_v21 = vmul.f32 0.2, %v66_v18  ;;  %v208_v22 = vmul.f32 0.2, %v206_v19 }
  0x87   :  { %v60_v24 = vpop.permute.xlu0 %59  ;;  %v200_v25 = vpop.permute.xlu1 %199 }
  0x88   :  { %v70_v26 = vmax.f32 %v66_v18, %v68_v21  ;;  %v210_v27 = vmax.f32 %v206_v19, %v208_v22  ;;  %v67_v28 = vadd.f32 %v65_v13, %v60_v24  ;;  %v207_v29 = vadd.f32 %v205_v14, %v200_v25  ;;  %v75_v13 = vld [vmem:[#allocation2 + $0x8] sm:$0xff]  ;;  %v801_v24 = vld [vmem:[%s1111_s4] sm:$0xff]   ;;  %s864_s4 = smov 120  }
  0x8a   :  { %v69_v33 = vmul.f32 0.2, %v67_v28  ;;  %v209_v34 = vmul.f32 0.2, %v207_v29  ;;  %v932_v35 = vadd.f32 %v731_v23, %v70_v26  ;;  %v934_v36 = vadd.f32 %v731_v23, %v210_v27 }
  0x8c   :  { %v71_v37 = vmax.f32 %v67_v28, %v69_v33  ;;  %v211_v38 = vmax.f32 %v207_v29, %v209_v34  ;;  %v77_v39 = vsel %vm76_vm2, %v932_v35, -inf  ;;  %v340_v40 = vpop.permute.xlu0 %339  ;;  %v344_v41 = vpop.permute.xlu1 %343  ;;  %v216_v46 = vsel %vm76_vm2, %v934_v36, -inf }
  0x8d   :  { %78 = vmax.xlane.f32.xlu1 %v77_v39  ;;  %v350_v42 = vadd.f32 %v349_v31, %v340_v40  ;;  %v351_v43 = vadd.f32 %v349_v31, %v344_v41 }
  0x8e   :  { %v938_v44 = vadd.f32 %v732_v30, %v71_v37  ;;  %v940_v45 = vadd.f32 %v732_v30, %v211_v38 }
  0x8f   :  { %v352_v48 = vmul.f32 0.2, %v350_v42  ;;  %v353_v49 = vmul.f32 0.2, %v351_v43 }
  0x90   :  { %v80_v50 = vsel %vm76_vm2, %v938_v44, -inf  ;;  %v219_v55 = vsel %vm76_vm2, %v940_v45, -inf }
  0x91   :  { %81 = vmax.xlane.f32.xlu0 %v80_v50  ;;  %217 = vmax.xlane.f32.xlu1 %v216_v46  ;;  %v354_v51 = vmax.f32 %v350_v42, %v352_v48  ;;  %v355_v52 = vmax.f32 %v351_v43, %v353_v49  ;;  %v484_v53 = vpop.permute.xlu1 %483  ;;  %v488_v54 = vpop.permute.xlu0 %487  ;;  %v863_v43 = vmov 0.0  }
  0x92   :  { %v494_v56 = vadd.f32 %v493_v47, %v484_v53  ;;  %v495_v57 = vadd.f32 %v493_v47, %v488_v54  ;;  %747 = vmatprep.subr.bf16.mxu1 %v863_v43  ;;  %741 = vmatprep.subr.bf16.mxu0 %v863_v43 }
  0x93   :  { %v948_v58 = vadd.f32 %v731_v23, %v354_v51  ;;  %v950_v59 = vadd.f32 %v732_v30, %v355_v52  ;;  %742 = vmatpush3.bf16.msra.mxu0 %v801_v24  ;;  %749 = vmatprep.mubr.msk.bf16.mxu1 %vm865_vm7, %v863_v43 }
  0x94   :  { %v496_v60 = vmul.f32 0.2, %v494_v56  ;;  %v497_v61 = vmul.f32 0.2, %v495_v57  ;;  %743 = vmatprep.mubr.msk.bf16.mxu0 %vm865_vm7, %v863_v43  ;;  %753 = vmatprep.subr.bf16.mxu0 %v863_v43 }
  0x95   :  { %220 = vmax.xlane.f32.xlu0 %v219_v55  ;;  %v360_v62 = vsel %vm76_vm2, %v948_v58, -inf  ;;  %v363_v1 = vsel %vm76_vm2, %v950_v59, -inf }
  0x96   :  { %v498_v63 = vmax.f32 %v494_v56, %v496_v60  ;;  %361 = vmax.xlane.f32.xlu1 %v360_v62  ;;  %v499_v0 = vmax.f32 %v495_v57, %v497_v61 }
  0x98   :  { %v956_v2 = vadd.f32 %v731_v23, %v498_v63  ;;  %v958_v5 = vadd.f32 %v732_v30, %v499_v0 }
  0x99   :  { %364 = vmax.xlane.f32.xlu0 %v363_v1 }
  0x9a   :  { %v504_v8 = vsel %vm76_vm2, %v956_v2, -inf  ;;  %v507_v9 = vsel %vm76_vm2, %v958_v5, -inf }
  0x9b   :  { %505 = vmax.xlane.f32.xlu1 %v504_v8 }
  0x9d   :  { %508 = vmax.xlane.f32.xlu0 %v507_v9 }
 0x11a   :  { %v79_v11 = vpop.xlane.xlu1 %78 }
 0x11b   :  { %v83_v12 = vmax.f32 %v74_v10, %v79_v11 }
 0x11d   :  { %192 = vst.msk [vmem:[#allocation2] sm:$0xff] %vm119_vm3, %v83_v12  ;;  %v85_v16 = vsub.f32 %v74_v10, %v83_v12 }
 0x11e   :  { %v82_v14 = vpop.xlane.xlu0 %81  ;;  %v218_v19 = vpop.xlane.xlu1 %217 }
 0x11f   :  { %v84_v15 = vmax.f32 %v75_v13, %v82_v14  ;;  %v87_v17 = vmul.f32 1.442695, %v85_v16 }
 0x121   :  { %193 = vst.msk [vmem:[#allocation2 + $0x8] sm:$0xff] %vm119_vm3, %v84_v15  ;;  %802 = vpow2.f32 %v87_v17  ;;  %v86_v39 = vsub.f32 %v75_v13, %v84_v15 }
 0x122   :  { %v221_v22 = vpop.xlane.xlu0 %220 }
 0x123   :  { %v362_v25 = vpop.xlane.xlu1 %361  ;;  %v89_v47 = vmul.f32 1.442695, %v86_v39 }
 0x124   :  { %v966_v18 = vld [vmem:[#allocation2] sm:$0xff] }
 0x125   :  { %v969_v20 = vmax.f32 %v966_v18, %v218_v19 }
 0x126   :  { %v365_v28 = vpop.xlane.xlu0 %364 }
 0x127   :  { %336 = vst.msk [vmem:[#allocation2] sm:$0xff] %vm258_vm4, %v969_v20  ;;  %232 = vperm.xlu1 %789, %v969_v20   ;;  %v224_v48 = vsub.f32 %v966_v18, %v969_v20 }
 0x128   :  { %v215_v21 = vld [vmem:[#allocation2 + $0x8] sm:$0xff]  ;;  %v506_v33 = vpop.xlane.xlu1 %505 }
 0x129   :  { %v223_v23 = vmax.f32 %v215_v21, %v221_v22  ;;  %v226_v52 = vmul.f32 1.442695, %v224_v48 }
 0x12a   :  { %v509_v40 = vpop.xlane.xlu0 %508 }
 0x12b   :  { %337 = vst.msk [vmem:[#allocation2 + $0x8] sm:$0xff] %vm258_vm4, %v223_v23  ;;  %237 = vperm.xlu0 %790, %v223_v23   ;;  %791 = vset.pattern.permute.xlu1 %v858_v3  ;;  %v981_v29 = vpop.eup %802  ;;  %v225_v51 = vsub.f32 %v215_v21, %v223_v23 }
 0x12c   :  { %93 = vperm.xlu1 %791, %v83_v12  }
 0x12d   :  { %v228_v53 = vmul.f32 1.442695, %v225_v51 }
 0x12e   :  { %v358_v26 = vld [vmem:[#allocation2] sm:$0xff] }
 0x12f   :  { %v366_v27 = vmax.f32 %v358_v26, %v362_v25  ;;  %564 = vrot.lane.b32.xlu0 %v801_v24, %s862_s29 }
 0x130   :  { %98 = vperm.xlu1 %791, %v84_v15   ;;  %794 = vset.pattern.permute.xlu0 %v858_v3 }
 0x131   :  { %480 = vst.msk [vmem:[#allocation2] sm:$0xff] %vm402_vm5, %v366_v27  ;;  %v368_v54 = vsub.f32 %v358_v26, %v366_v27 }
 0x132   :  { %v359_v30 = vld [vmem:[#allocation2 + $0x8] sm:$0xff] }
 0x133   :  { %v367_v31 = vmax.f32 %v359_v30, %v365_v28  ;;  %126 = vperm.xlu0 %794, %v981_v29   ;;  %v370_v56 = vmul.f32 1.442695, %v368_v54 }
 0x134   :  { %792 = vset.pattern.permute.xlu1 %v860_v6 }
 0x135   :  { %v369_v32 = vsub.f32 %v359_v30, %v367_v31  ;;  %481 = vst.msk [vmem:[#allocation2 + $0x8] sm:$0xff] %vm402_vm5, %v367_v31  ;;  %376 = vperm.xlu1 %792, %v366_v27  }
 0x137   :  { %v372_v34 = vmul.f32 1.442695, %v369_v32  ;;  %798 = vset.pattern.permute.xlu0 %v860_v6 }
 0x138   :  { %v987_v37 = vld [vmem:[#allocation2] sm:$0xff] }
 0x139   :  { %804 = vpow2.f32 %v372_v34  ;;  %v990_v38 = vmax.f32 %v987_v37, %v506_v33  ;;  %381 = vperm.xlu1 %792, %v367_v31  }
 0x13a   :  { %806 = vpow2.f32 %v89_v47 }
 0x13b   :  { %v512_v41 = vsub.f32 %v987_v37, %v990_v38  ;;  %624 = vst.msk [vmem:[#allocation2] sm:$0xff] %vm546_vm6, %v990_v38  ;;  %808 = vpow2.f32 %v226_v52 }
 0x13c   :  { %v996_v42 = vld [vmem:[#allocation2 + $0x8] sm:$0xff]  ;;  %810 = vpow2.f32 %v228_v53 }
 0x13d   :  { %v1001_v46 = vmax.f32 %v996_v42, %v509_v40  ;;  %276 = vrot.lane.b32.xlu1 %v801_v24, %s864_s4  ;;  %812 = vpow2.f32 %v370_v56  ;;  %v107_v56 = vld [vmem:[#allocation3] sm:$0xff] }
 0x13e   :  { %793 = vset.pattern.permute.xlu1 %v861_v7 }
 0x13f   :  { %v513_v49 = vsub.f32 %v996_v42, %v1001_v46  ;;  %625 = vst.msk [vmem:[#allocation2 + $0x8] sm:$0xff] %vm546_vm6, %v1001_v46 }
 0x141   :  { %520 = vperm.xlu1 %793, %v990_v38  }
 0x143   :  { %v1016_v50 = vpop.eup %804 }
 0x144   :  { %414 = vperm.xlu0 %798, %v1016_v50   ;;  %v1022_v55 = vpop.eup %806 }
 0x145   :  { %525 = vperm.xlu1 %793, %v1001_v46   ;;  %v1025_v57 = vpop.eup %808 }
 0x146   :  { %v1029_v60 = vpop.eup %810 }
 0x147   :  { %v1032_v61 = vpop.eup %812 }
 0x148   :  { %800 = vset.pattern.permute.xlu0 %v861_v7 }
 0x149   :  { %420 = vrot.lane.b32.xlu1 %v801_v24, %s866_s30 }
 0x14a   :  { %795 = vset.pattern.permute.xlu1 %v858_v3 }
 0x14d   :  { %131 = vperm.xlu1 %795, %v1022_v55  }
 0x151   :  { %796 = vset.pattern.permute.xlu1 %v859_v4 }
 0x152   :  { %265 = vperm.xlu1 %796, %v1025_v57  }
 0x156   :  { %270 = vperm.xlu1 %796, %v1029_v60  }
 0x15a   :  { %797 = vset.pattern.permute.xlu1 %v860_v6 }
 0x15b   :  { %409 = vperm.xlu1 %797, %v1032_v61  }
 0x15f   :  { %799 = vset.pattern.permute.xlu1 %v861_v7 }
 0x1a6   :  { %v233_v3 = vpop.permute.xlu1 %232 }
 0x1a7   :  { %v240_v62 = vsub.f32 %v934_v36, %v233_v3  ;;  %v109_v3 = vmul.f32 %v981_v29, %v107_v56 }
 0x1a9   :  { %v242_v8 = vmul.f32 1.442695, %v240_v62 }
 0x1aa   :  { %v238_v63 = vpop.permute.xlu0 %237 }
 0x1ab   :  { %v241_v4 = vsub.f32 %v940_v45, %v238_v63  ;;  %v94_v0 = vpop.permute.xlu1 %93 }
 0x1ac   :  { %v101_v1 = vsub.f32 %v932_v35, %v94_v0 }
 0x1ad   :  { %v244_v9 = vmul.f32 1.442695, %v241_v4  ;;  %v108_v4 = vld [vmem:[#allocation3 + $0x8] sm:$0xff] }
 0x1ae   :  { %v103_v10 = vmul.f32 1.442695, %v101_v1  ;;  %v565_v23 = vpop.permute.xlu0 %564  ;;  %v110_v1 = vmul.f32 %v1022_v55, %v108_v4  ;;  %v514_v55 = vmul.f32 1.442695, %v512_v41  ;;  %v122_v41 = vld [vmem:[#allocation4] sm:$0xff] }
 0x1af   :  { %v99_v11 = vpop.permute.xlu1 %98 }
 0x1b0   :  { %814 = vpow2.f32 %v103_v10  ;;  %v102_v6 = vsub.f32 %v938_v44, %v99_v11 }
 0x1b1   :  { %816 = vpow2.f32 %v242_v8 }
 0x1b2   :  { %818 = vpow2.f32 %v244_v9  ;;  %v105_v12 = vmul.f32 1.442695, %v102_v6  ;;  %v127_v53 = vpop.permute.xlu0 %126 }
 0x1b4   :  { %820 = vpow2.f32 %v105_v12  ;;  %v377_v7 = vpop.permute.xlu1 %376 }
 0x1b5   :  { %v384_v36 = vsub.f32 %v948_v58, %v377_v7 }
 0x1b7   :  { %v386_v13 = vmul.f32 1.442695, %v384_v36 }
 0x1b8   :  { %v382_v14 = vpop.permute.xlu1 %381 }
 0x1b9   :  { %822 = vpow2.f32 %v386_v13  ;;  %v385_v45 = vsub.f32 %v950_v59, %v382_v14 }
 0x1ba   :  { %v815_v35 = vpop.eup %814 }
 0x1bb   :  { %v817_v15 = vpop.eup %816  ;;  %v388_v16 = vmul.f32 1.442695, %v385_v45  ;;  %v111_v17 = vsel %vm76_vm2, %v815_v35, 0.0 }
 0x1bc   :  { %v819_v18 = vpop.eup %818  ;;  %112 = vadd.xlane.f32.xlu1 %v111_v17  ;;  %v277_v44 = vpop.permute.xlu1 %276  ;;  %v250_v58 = vsel %vm76_vm2, %v817_v15, 0.0 }
 0x1bd   :  { %824 = vpow2.f32 %v388_v16  ;;  %748 = vmatpush3.bf16.msra.mxu1 %v277_v44  ;;  %v275_v21 = vpack.c.bf16 %v819_v18, %v817_v15  ;;  %v253_v27 = vsel %vm76_vm2, %v819_v18, 0.0 }
 0x1be   :  { %v821_v19 = vpop.eup %820  ;;  %759 = vmatprep.subr.bf16.mxu1 %v863_v43 }
 0x1bf   :  { %v114_v20 = vsel %vm76_vm2, %v821_v19, 0.0  ;;  %v136_v22 = vpack.c.bf16 %v821_v19, %v815_v35 }
 0x1c0   :  { %251 = vadd.xlane.f32.xlu1 %v250_v58  ;;  %115 = vadd.xlane.f32.xlu0 %v114_v20  ;;  %v521_v59 = vpop.permute.xlu1 %520  ;;  %v134_v58 = vmul.f32 %v127_v53, %v122_v41 }
 0x1c1   :  { %750 = vmatmul.mubr.msk.bf16.vlgmr.msra.gmra.mrb[0].mxu1 %vm76_vm2, %v275_v21  ;;  %v528_v24 = vsub.f32 %v956_v2, %v521_v59  ;;  %744 = vmatmul.mubr.msk.bf16.vlgmr.msra.gmra.mrb[0].mxu0 %vm76_vm2, %v136_v22 }
 0x1c2   :  { %755 = vmatprep.mubr.msk.bf16.mxu0 %vm865_vm7, %v863_v43  ;;  %760 = vmatpush3.bf16.msra.mxu1 %v565_v23 }
 0x1c3   :  { %v823_v25 = vpop.eup %822  ;;  %v530_v26 = vmul.f32 1.442695, %v528_v24  ;;  %761 = vmatprep.mubr.msk.bf16.mxu1 %vm865_vm7, %v863_v43  ;;  %v1071_v62 = vpop.permute.xlu0 %414 }
 0x1c4   :  { %254 = vadd.xlane.f32.xlu0 %v253_v27  ;;  %v526_v28 = vpop.permute.xlu1 %525  ;;  %v394_v30 = vsel %vm76_vm2, %v823_v25, 0.0 }
 0x1c5   :  { %826 = vpow2.f32 %v530_v26  ;;  %v529_v2 = vsub.f32 %v958_v5, %v526_v28  ;;  %395 = vadd.xlane.f32.xlu1 %v394_v30  ;;  %v516_v30 = vmul.f32 1.442695, %v513_v49 }
 0x1c7   :  { %v825_v31 = vpop.eup %824  ;;  %v532_v32 = vmul.f32 1.442695, %v529_v2 }
 0x1c8   :  { %v421_v33 = vpop.permute.xlu1 %420  ;;  %v397_v34 = vsel %vm76_vm2, %v825_v31, 0.0  ;;  %v419_v39 = vpack.c.bf16 %v825_v31, %v823_v25 }
 0x1c9   :  { %828 = vpow2.f32 %v532_v32  ;;  %398 = vadd.xlane.f32.xlu0 %v397_v34  ;;  %754 = vmatpush3.bf16.msra.mxu0 %v421_v33 }
 0x1ca   :  { %830 = vpow2.f32 %v514_v55 }
 0x1cb   :  { %832 = vpow2.f32 %v516_v30 }
 0x1cc   :  { %756 = vmatmul.mubr.msk.bf16.vlgmr.msra.gmra.mrb[4].mxu0 %vm76_vm2, %v419_v39  ;;  %v132_v48 = vpop.permute.xlu1 %131 }
 0x1cf   :  { %v827_v40 = vpop.eup %826 }
 0x1d0   :  { %v538_v43 = vsel %vm76_vm2, %v827_v40, 0.0 }
 0x1d1   :  { %539 = vadd.xlane.f32.xlu1 %v538_v43  ;;  %v1064_v51 = vpop.permute.xlu1 %265 }
 0x1d3   :  { %v1060_v47 = vpop.eup %828 }
 0x1d4   :  { %v563_v5 = vpack.c.bf16 %v1060_v47, %v827_v40  ;;  %v831_v18 = vpop.eup %830  ;;  %v541_v42 = vsel %vm76_vm2, %v1060_v47, 0.0 }
 0x1d5   :  { %v1066_v52 = vpop.permute.xlu1 %270  ;;  %v833_v34 = vpop.eup %832 }
 0x1d6   :  { %762 = vmatmul.mubr.msk.bf16.vlgmr.msra.gmra.mrb[4].mxu1 %vm76_vm2, %v563_v5 }
 0x1da   :  { %v1068_v54 = vpop.permute.xlu1 %409 }
 0x249   :  { %v113_v63 = vpop.xlane.xlu1 %112 }
 0x24a   :  { %v117_v0 = vadd.f32 %v113_v63, %v109_v3 }
 0x24c   :  { %120 = vst.msk [vmem:[#allocation3] sm:$0xff] %vm119_vm3, %v117_v0 }
 0x24d   :  { %v116_v8 = vpop.xlane.xlu0 %115  ;;  %v252_v6 = vpop.xlane.xlu1 %251 }
 0x24e   :  { %v118_v9 = vadd.f32 %v116_v8, %v110_v1 }
 0x250   :  { %121 = vst.msk [vmem:[#allocation3 + $0x8] sm:$0xff] %vm119_vm3, %v118_v9 }
 0x251   :  { %v255_v36 = vpop.xlane.xlu0 %254 }
 0x253   :  { %v246_v10 = vld [vmem:[#allocation3] sm:$0xff] }
 0x254   :  { %v248_v11 = vmul.f32 %v1025_v57, %v246_v10  ;;  %v396_v57 = vpop.xlane.xlu1 %395 }
 0x256   :  { %v256_v12 = vadd.f32 %v252_v6, %v248_v11 }
 0x257   :  { %v247_v7 = vld [vmem:[#allocation3 + $0x8] sm:$0xff] }
 0x258   :  { %259 = vst.msk [vmem:[#allocation3] sm:$0xff] %vm258_vm4, %v256_v12  ;;  %v249_v29 = vmul.f32 %v1029_v60, %v247_v7  ;;  %v399_v60 = vpop.xlane.xlu0 %398 }
 0x25a   :  { %v257_v13 = vadd.f32 %v255_v36, %v249_v29 }
 0x25c   :  { %260 = vst.msk [vmem:[#allocation3 + $0x8] sm:$0xff] %vm258_vm4, %v257_v13 }
 0x25e   :  { %v540_v37 = vpop.xlane.xlu1 %539 }
 0x25f   :  { %v390_v14 = vld [vmem:[#allocation3] sm:$0xff] }
 0x260   :  { %v392_v45 = vmul.f32 %v1032_v61, %v390_v14  ;;  %v123_v61 = vld [vmem:[#allocation4 + $0x8] sm:$0xff] }
 0x261   :  { %v135_v22 = vmul.f32 %v132_v48, %v123_v61 }
 0x262   :  { %v400_v35 = vadd.f32 %v396_v57, %v392_v45 }
 0x263   :  { %v391_v15 = vld [vmem:[#allocation3 + $0x8] sm:$0xff] }
 0x264   :  { %403 = vst.msk [vmem:[#allocation3] sm:$0xff] %vm402_vm5, %v400_v35  ;;  %v393_v16 = vmul.f32 %v1016_v50, %v391_v15 }
 0x266   :  { %v401_v17 = vadd.f32 %v399_v60, %v393_v16 }
 0x268   :  { %404 = vst.msk [vmem:[#allocation3 + $0x8] sm:$0xff] %vm402_vm5, %v401_v17 }
 0x26b   :  { %v534_v44 = vld [vmem:[#allocation3] sm:$0xff] }
 0x26c   :  { %v536_v19 = vmul.f32 %v831_v18, %v534_v44 }
 0x26e   :  { %v544_v38 = vadd.f32 %v540_v37, %v536_v19 }
 0x26f   :  { %v535_v13 = vld [vmem:[#allocation3 + $0x8] sm:$0xff] }
 0x270   :  { %547 = vst.msk [vmem:[#allocation3] sm:$0xff] %vm546_vm6, %v544_v38  ;;  %v537_v55 = vmul.f32 %v833_v34, %v535_v13 }
 0x294   :  { %v316_v20 = vpop.f32.mrb[0].mxu1  ;;  %v180_v21 = vpop.f32.mrb[0].mxu0 }
 0x295   :  { %v187_v59 = vadd.f32 %v180_v21, %v134_v58  ;;  %325 = vrot.lane.b32.xlu0 %v316_v20, %s867_s7  ;;  %v751_v50 = vpop.f32.mrb[1].mxu1  ;;  %v745_v23 = vpop.f32.mrb[1].mxu0 }
 0x296   :  { %v319_v24 = vpop.f32.mrb[2].mxu1  ;;  %v183_v25 = vpop.f32.mrb[2].mxu0 }
 0x297   :  { %190 = vst.msk [vmem:[#allocation4] sm:$0xff] %vm189_vm8, %v187_v59  ;;  %v188_v26 = vadd.f32 %v183_v25, %v135_v22  ;;  %v752_v27 = vpop.f32.mrb[3].mxu1  ;;  %327 = vrot.lane.b32.xlu1 %v319_v24, %s867_s7  ;;  %v746_v28 = vpop.f32.mrb[3].mxu0 }
 0x299   :  { %191 = vst.msk [vmem:[#allocation4 + $0x8] sm:$0xff] %vm189_vm8, %v188_v26 }
 0x29b   :  { %553 = vperm.xlu1 %799, %v831_v18  }
 0x29e   :  { %v261_v46 = vld [vmem:[#allocation4] sm:$0xff] }
 0x29f   :  { %v460_v2 = vpop.f32.mrb[4].mxu0  ;;  %v273_v48 = vmul.f32 %v1064_v51, %v261_v46 }
 0x2a0   :  { %469 = vrot.lane.b32.xlu1 %v460_v2, %s868_s8  ;;  %v757_v31 = vpop.f32.mrb[5].mxu0  ;;  %v262_v49 = vld [vmem:[#allocation4 + $0x8] sm:$0xff] }
 0x2a1   :  { %v463_v32 = vpop.f32.mrb[6].mxu0  ;;  %v274_v3 = vmul.f32 %v1066_v52, %v262_v49 }
 0x2a2   :  { %v758_v33 = vpop.f32.mrb[7].mxu0 }
 0x2a4   :  { %471 = vrot.lane.b32.xlu1 %v463_v32, %s868_s8 }
 0x2a8   :  { %558 = vperm.xlu1 %799, %v833_v34  }
 0x2a9   :  { %v604_v39 = vpop.f32.mrb[4].mxu1 }
 0x2aa   :  { %v763_v40 = vpop.f32.mrb[5].mxu1 }
 0x2ab   :  { %v607_v43 = vpop.f32.mrb[6].mxu1 }
 0x2ac   :  { %v764_v5 = vpop.f32.mrb[7].mxu1  ;;  %613 = vrot.lane.b32.xlu1 %v604_v39, %s869_s9 }
 0x2b4   :  { %542 = vadd.xlane.f32.xlu0 %v541_v42 }
 0x2ca   :  { %615 = vrot.lane.b32.xlu0 %v607_v43, %s869_s9 }
 0x307   :  { %v326_v53 = vpop.permute.xlu0 %325 }
 0x308   :  { %v331_v56 = vadd.f32 %v326_v53, %v273_v48 }
 0x309   :  { %v328_v63 = vpop.permute.xlu1 %327 }
 0x30a   :  { %334 = vst.msk [vmem:[#allocation4] sm:$0xff] %vm333_vm9, %v331_v56  ;;  %v332_v4 = vadd.f32 %v328_v63, %v274_v3 }
 0x30c   :  { %335 = vst.msk [vmem:[#allocation4 + $0x8] sm:$0xff] %vm333_vm9, %v332_v4 }
 0x311   :  { %v405_v1 = vld [vmem:[#allocation4] sm:$0xff] }
 0x312   :  { %v417_v8 = vmul.f32 %v1068_v54, %v405_v1 }
 0x313   :  { %v406_v9 = vld [vmem:[#allocation4 + $0x8] sm:$0xff] }
 0x314   :  { %v418_v51 = vmul.f32 %v1071_v62, %v406_v9 }
 0x31a   :  { %v554_v0 = vpop.permute.xlu1 %553 }
 0x31e   :  { %v470_v47 = vpop.permute.xlu1 %469 }
 0x31f   :  { %v475_v10 = vadd.f32 %v470_v47, %v417_v8 }
 0x321   :  { %478 = vst.msk [vmem:[#allocation4] sm:$0xff] %vm477_vm10, %v475_v10 }
 0x322   :  { %v472_v11 = vpop.permute.xlu1 %471 }
 0x323   :  { %v476_v6 = vadd.f32 %v472_v11, %v418_v51 }
 0x325   :  { %479 = vst.msk [vmem:[#allocation4 + $0x8] sm:$0xff] %vm477_vm10, %v476_v6 }
 0x327   :  { %v559_v12 = vpop.permute.xlu1 %558 }
 0x328   :  { %v549_v52 = vld [vmem:[#allocation4] sm:$0xff] }
 0x329   :  { %v561_v7 = vmul.f32 %v554_v0, %v549_v52 }
 0x32b   :  { %v614_v29 = vpop.permute.xlu1 %613 }
 0x32c   :  { %v619_v36 = vadd.f32 %v614_v29, %v561_v7  ;;  %v550_v54 = vld [vmem:[#allocation4 + $0x8] sm:$0xff] }
 0x32d   :  { %v562_v57 = vmul.f32 %v559_v12, %v550_v54 }
 0x32e   :  { %622 = vst.msk [vmem:[#allocation4] sm:$0xff] %vm621_vm11, %v619_v36 }
 0x341   :  { %v543_v14 = vpop.xlane.xlu0 %542 }
 0x342   :  { %v545_v45 = vadd.f32 %v543_v14, %v537_v55 }
 0x344   :  { %548 = vst.msk [vmem:[#allocation3 + $0x8] sm:$0xff] %vm546_vm6, %v545_v45 }
 0x345   :  { %v616_v35 = vpop.permute.xlu0 %615 }
 0x346   :  { %v620_v62 = vadd.f32 %v616_v35, %v562_v57 }
 0x348   :  { %623 = vst.msk [vmem:[#allocation4 + $0x8] sm:$0xff] %vm621_vm11, %v620_v62 }
 0x349 PF:  { %v631_v15 = vld [vmem:[#allocation3] sm:$0xff]  ;;  %v870_v16 = vmov 1   ;;  %v871_v60 = vmov 0   ;;  %v872_v18 = vmov 2   ;;  %v873_v44 = vmov 3   ;;  %v629_v24 = vld [vmem:[#allocation4] sm:$0xff] }
 0x34a   :  { %835 = vset.pattern.permute.xlu1 %v870_v16  ;;  %834 = vset.pattern.permute.xlu0 %v871_v60  ;;  %vm683_vm12 = vcmask 64512   ;;  %vm686_vm13 = vcmask 130048   ;;  %vm689_vm14 = vcmask 195584   ;;  %v724_v43 = vld [vmem:[%s1112_s5] ss:$0 sm:$0xff]  ;;  %vm711_vm15 = vcmask 257024  }
 0x34b   :  { %648 = vperm.xlu1 %835, %v631_v15   ;;  %635 = vperm.xlu0 %834, %v631_v15   ;;  %v632_v17 = vld [vmem:[#allocation3 + $0x8] sm:$0xff] }
 0x34f   :  { %652 = vperm.xlu1 %835, %v632_v17   ;;  %640 = vperm.xlu0 %834, %v632_v17   ;;  %v630_v26 = vld [vmem:[#allocation4 + $0x8] sm:$0xff] }
 0x353   :  { %837 = vset.pattern.permute.xlu1 %v872_v18  ;;  %836 = vset.pattern.permute.xlu0 %v872_v18 }
 0x354   :  { %664 = vperm.xlu1 %837, %v632_v17   ;;  %660 = vperm.xlu0 %836, %v631_v15  }
 0x358   :  { %838 = vset.pattern.permute.xlu1 %v873_v44  ;;  %839 = vset.pattern.permute.xlu0 %v873_v44 }
 0x359   :  { %672 = vperm.xlu1 %838, %v631_v15   ;;  %676 = vperm.xlu0 %839, %v632_v17  }
 0x3ca   :  { %v649_v19 = vpop.permute.xlu1 %648  ;;  %v636_v37 = vpop.permute.xlu0 %635 }
 0x3cb   :  { %840 = vrcp.f32 %v649_v19 }
 0x3cc   :  { %842 = vrcp.f32 %v636_v37 }
 0x3ce   :  { %v653_v38 = vpop.permute.xlu1 %652  ;;  %v641_v41 = vpop.permute.xlu0 %640 }
 0x3cf   :  { %844 = vrcp.f32 %v653_v38 }
 0x3d0   :  { %846 = vrcp.f32 %v641_v41 }
 0x3d3   :  { %v665_v61 = vpop.permute.xlu1 %664  ;;  %v661_v58 = vpop.permute.xlu0 %660 }
 0x3d4   :  { %848 = vrcp.f32 %v665_v61 }
 0x3d5   :  { %850 = vrcp.f32 %v661_v58  ;;  %v841_v22 = vpop.eup %840 }
 0x3d6   :  { %v843_v59 = vpop.eup %842  ;;  %v656_v28 = vmul.f32 %v841_v22, %v629_v24 }
 0x3d7   :  { %v644_v30 = vmul.f32 %v843_v59, %v629_v24 }
 0x3d8   :  { %v673_v20 = vpop.permute.xlu1 %672  ;;  %v677_v21 = vpop.permute.xlu0 %676 }
 0x3d9   :  { %852 = vrcp.f32 %v673_v20  ;;  %v845_v50 = vpop.eup %844  ;;  %v684_v40 = vsel %vm683_vm12, %v644_v30, %v656_v28 }
 0x3da   :  { %854 = vrcp.f32 %v677_v21  ;;  %v847_v23 = vpop.eup %846  ;;  %v658_v2 = vmul.f32 %v845_v50, %v630_v26 }
 0x3db   :  { %v646_v31 = vmul.f32 %v847_v23, %v630_v26 }
 0x3dd   :  { %v685_v42 = vsel %vm683_vm12, %v646_v31, %v658_v2 }
 0x3de   :  { %v849_v25 = vpop.eup %848 }
 0x3df   :  { %v851_v27 = vpop.eup %850  ;;  %v670_v33 = vmul.f32 %v849_v25, %v630_v26 }
 0x3e0   :  { %v668_v32 = vmul.f32 %v851_v27, %v629_v24 }
 0x3e1   :  { %v688_v48 = vsel %vm686_vm13, %v685_v42, %v670_v33 }
 0x3e2   :  { %v687_v46 = vsel %vm686_vm13, %v684_v40, %v668_v32 }
 0x3e3   :  { %v853_v34 = vpop.eup %852 }
 0x3e4   :  { %v855_v39 = vpop.eup %854  ;;  %v680_v5 = vmul.f32 %v853_v34, %v629_v24 }
 0x3e5   :  { %v682_v49 = vmul.f32 %v855_v39, %v630_v26 }
 0x3e6   :  { %v690_v53 = vsel %vm689_vm14, %v687_v46, %v680_v5 }
 0x3e7   :  { %v699_v56 = vadd.f32 %v724_v43, %v690_v53  ;;  %v691_v3 = vsel %vm689_vm14, %v688_v48, %v682_v49 }
 0x3e8   :  { %v700_v63 = vadd.f32 %v724_v43, %v691_v3 }
 0x3e9   :  { %v701_v4 = vmax.f32 %v699_v56, 0.0 }
 0x3ea   :  { %v702_v0 = vmax.f32 %v700_v63, 0.0 }
 0x3eb   :  { %v727_v1 = vpack.c.bf16 %v701_v4, %v701_v4 }
 0x3ec   :  { %v728_v8 = vpack.c.bf16 %v702_v0, %v702_v0 }
 0x3ed   :  { %712 = vst.msk [vmem:[%s1113_s6] sm:$0xf] %vm711_vm15, %v727_v1 }
 0x3ee   :  { %713 = vst.msk [vmem:[%s1113_s6 + $0x4] sm:$0xf] %vm711_vm15, %v728_v8 }

// kernel: gat_model_forward.7
= control target key start
LH: loop header
LB: loop body
LE: loop exit
PB: predicated region body
PF: predicated region fallthrough
CT: control target
= control target key end

     0   :  { %vm27_vm0 = vcmask 31744   ;;  %vm32_vm1 = vcmask 261120   ;;  %v844_v0 = vmov -1e+30   ;;  %v845_v1 = vmov 0.0   ;;  %s1099_s0 = inlined_call_operand.<no memory space> [shape: s32[1,1], index: 0, kind: input, shape index: {}]   ;;  %s1100_s1 = inlined_call_operand.vmem [shape: bf16[16,16], index: 1, kind: input, shape index: {}]   ;;  %s1101_s2 = inlined_call_operand.vmem [shape: f32[4,16], index: 2, kind: input, shape index: {}]   ;;  %s1102_s3 = inlined_call_operand.vmem [shape: f32[16,4], index: 3, kind: input, shape index: {}]   ;;  %s1103_s4 = inlined_call_operand.vmem [shape: bf16[16,32], index: 4, kind: input, shape index: {}]   ;;  %s1104_s5 = inlined_call_operand.vmem [shape: f32[1,32], index: 5, kind: input, shape index: {}]   ;;  %s1105_s6 = inlined_call_operand.vmem [shape: f32[16,32], index: 6, kind: output, shape index: {}]  }
   0x1   :  { %28 = vst.msk [vmem:[#allocation2] sm:$0xff] %vm27_vm0, %v844_v0  ;;  %29 = vst.msk [vmem:[#allocation2 + $0x8] sm:$0xff] %vm27_vm0, %v844_v0  ;;  %p710_p0 = scmp.le.s32.totalorder %s1099_s0, 0 }
   0x2   :  { %30 = vst.msk [vmem:[#allocation3] sm:$0xff] %vm27_vm0, %v845_v1  ;;  %31 = vst.msk [vmem:[#allocation3 + $0x8] sm:$0xff] %vm27_vm0, %v845_v1  ;;  %v50_v2 = vld [vmem:[%s1102_s3] sm:$0xff] (!%p710_p0)  ;;  %v846_v3 = vmov (!%p710_p0), 0   ;;  %v847_v4 = vmov (!%p710_p0), 1   ;;  %v51_v5 = vld [vmem:[%s1102_s3 + $0x8] sm:$0xff] (!%p710_p0)  ;;  %v62_v8 = vlaneseq (!%p710_p0) }
   0x3   :  { %33 = vst.msk [vmem:[#allocation4] sm:$0xff] %vm32_vm1, %v845_v1  ;;  %34 = vst.msk [vmem:[#allocation4 + $0x8] sm:$0xff] %vm32_vm1, %v845_v1  ;;  %42 = sbr.rel (%p710_p0) target bundleno = 841 (0x349), region = 29  ;;  %771 = vset.pattern.permute.xlu0 (!%p710_p0), %v846_v3  ;;  %772 = vset.pattern.permute.xlu1 (!%p710_p0), %v847_v4  ;;  %v848_v6 = vmov (!%p710_p0), 2   ;;  %v849_v7 = vmov (!%p710_p0), 3   ;;  %v718_v17 = vld [vmem:[%s1100_s1] sm:$0xff] (!%p710_p0)  }
   0x4   :  { %54 = vperm.xlu0 (!%p710_p0), %771, %v50_v2   ;;  %195 = vperm.xlu1 (!%p710_p0), %772, %v50_v2   ;;  %v63_v9 = vshrl.u32 (!%p710_p0), %v62_v8, 7  ;;  %v49_v12 = vld [vmem:[%s1101_s2] sm:$0xf] (!%p710_p0)  ;;  %v719_v23 = vunpack.c.l.bf16 (!%p710_p0), %v718_v17  ;;  %vm76_vm2 = vcmask (!%p710_p0), 130048   ;;  %v720_v30 = vunpack.c.h.bf16 (!%p710_p0), %v718_v17  ;;  %s850_s29 = smov (!%p710_p0), 104   ;;  %s854_s30 = smov (!%p710_p0), 112  }
   0x5   :  { %vm119_vm3 = vcmask (!%p710_p0), 7168   ;;  %vm258_vm4 = vcmask (!%p710_p0), 15368   ;;  %vm402_vm5 = vcmask (!%p710_p0), 23568   ;;  %vm546_vm6 = vcmask (!%p710_p0), 31768   ;;  %s855_s7 = smov (!%p710_p0), 8   ;;  %s856_s8 = smov (!%p710_p0), 16  }
   0x6   :  { %v64_v10 = vsub.s32 (!%p710_p0), 0, %v63_v9  ;;  %v204_v11 = vsub.s32 (!%p710_p0), 1, %v63_v9  ;;  %v348_v20 = vsub.s32 (!%p710_p0), 2, %v63_v9  ;;  %v492_v32 = vsub.s32 (!%p710_p0), 3, %v63_v9  ;;  %s857_s9 = smov (!%p710_p0), 24  }
   0x7   :  { %vm853_vm7 = vmmov (!%p710_p0), 0   ;;  %vm189_vm8 = vcmask (!%p710_p0), 64512   ;;  %vm333_vm9 = vcmask (!%p710_p0), 130112   ;;  %vm477_vm10 = vcmask (!%p710_p0), 195712  }
   0x8   :  { %59 = vperm.xlu0 (!%p710_p0), %771, %v51_v5   ;;  %199 = vperm.xlu1 (!%p710_p0), %772, %v51_v5   ;;  %v65_v13 = vrot.slane (!%p710_p0), %v49_v12, %v64_v10  ;;  %v205_v14 = vrot.slane (!%p710_p0), %v49_v12, %v204_v11  ;;  %v349_v31 = vrot.slane (!%p710_p0), %v49_v12, %v348_v20  ;;  %v74_v10 = vld [vmem:[#allocation2] sm:$0xff] (!%p710_p0)  ;;  %vm621_vm11 = vcmask (!%p710_p0), 261312  }
   0x9   :  { %v493_v47 = vrot.slane (!%p710_p0), %v49_v12, %v492_v32 }
   0xc   :  { %773 = vset.pattern.permute.xlu0 %v848_v6  ;;  %774 = vset.pattern.permute.xlu1 %v848_v6 }
   0xd   :  { %339 = vperm.xlu0 %773, %v50_v2   ;;  %343 = vperm.xlu1 %774, %v51_v5  }
  0x11   :  { %775 = vset.pattern.permute.xlu1 %v849_v7  ;;  %776 = vset.pattern.permute.xlu0 %v849_v7 }
  0x12   :  { %483 = vperm.xlu1 %775, %v50_v2   ;;  %487 = vperm.xlu0 %776, %v51_v5  }
  0x16   :  { %777 = vset.pattern.permute.xlu1 %v847_v4  ;;  %778 = vset.pattern.permute.xlu0 %v847_v4 }
  0x83   :  { %v55_v15 = vpop.permute.xlu0 %54  ;;  %v196_v16 = vpop.permute.xlu1 %195 }
  0x84   :  { %v66_v18 = vadd.f32 %v65_v13, %v55_v15  ;;  %v206_v19 = vadd.f32 %v205_v14, %v196_v16 }
  0x86   :  { %v68_v21 = vmul.f32 0.2, %v66_v18  ;;  %v208_v22 = vmul.f32 0.2, %v206_v19 }
  0x87   :  { %v60_v24 = vpop.permute.xlu0 %59  ;;  %v200_v25 = vpop.permute.xlu1 %199 }
  0x88   :  { %v70_v26 = vmax.f32 %v66_v18, %v68_v21  ;;  %v210_v27 = vmax.f32 %v206_v19, %v208_v22  ;;  %v67_v28 = vadd.f32 %v65_v13, %v60_v24  ;;  %v207_v29 = vadd.f32 %v205_v14, %v200_v25  ;;  %v75_v13 = vld [vmem:[#allocation2 + $0x8] sm:$0xff]  ;;  %v789_v24 = vld [vmem:[%s1103_s4] sm:$0xff]   ;;  %s852_s4 = smov 120  }
  0x8a   :  { %v69_v33 = vmul.f32 0.2, %v67_v28  ;;  %v209_v34 = vmul.f32 0.2, %v207_v29  ;;  %v922_v35 = vadd.f32 %v719_v23, %v70_v26  ;;  %v924_v36 = vadd.f32 %v719_v23, %v210_v27 }
  0x8c   :  { %v71_v37 = vmax.f32 %v67_v28, %v69_v33  ;;  %v211_v38 = vmax.f32 %v207_v29, %v209_v34  ;;  %v77_v39 = vsel %vm76_vm2, %v922_v35, -inf  ;;  %v340_v40 = vpop.permute.xlu0 %339  ;;  %v344_v41 = vpop.permute.xlu1 %343  ;;  %v216_v46 = vsel %vm76_vm2, %v924_v36, -inf }
  0x8d   :  { %78 = vmax.xlane.f32.xlu1 %v77_v39  ;;  %v350_v42 = vadd.f32 %v349_v31, %v340_v40  ;;  %v351_v43 = vadd.f32 %v349_v31, %v344_v41 }
  0x8e   :  { %v928_v44 = vadd.f32 %v720_v30, %v71_v37  ;;  %v930_v45 = vadd.f32 %v720_v30, %v211_v38 }
  0x8f   :  { %v352_v48 = vmul.f32 0.2, %v350_v42  ;;  %v353_v49 = vmul.f32 0.2, %v351_v43 }
  0x90   :  { %v80_v50 = vsel %vm76_vm2, %v928_v44, -inf  ;;  %v219_v55 = vsel %vm76_vm2, %v930_v45, -inf }
  0x91   :  { %81 = vmax.xlane.f32.xlu0 %v80_v50  ;;  %217 = vmax.xlane.f32.xlu1 %v216_v46  ;;  %v354_v51 = vmax.f32 %v350_v42, %v352_v48  ;;  %v355_v52 = vmax.f32 %v351_v43, %v353_v49  ;;  %v484_v53 = vpop.permute.xlu1 %483  ;;  %v488_v54 = vpop.permute.xlu0 %487  ;;  %v851_v43 = vmov 0.0  }
  0x92   :  { %v494_v56 = vadd.f32 %v493_v47, %v484_v53  ;;  %v495_v57 = vadd.f32 %v493_v47, %v488_v54  ;;  %735 = vmatprep.subr.bf16.mxu1 %v851_v43  ;;  %729 = vmatprep.subr.bf16.mxu0 %v851_v43 }
  0x93   :  { %v938_v58 = vadd.f32 %v719_v23, %v354_v51  ;;  %v940_v59 = vadd.f32 %v720_v30, %v355_v52  ;;  %730 = vmatpush3.bf16.msra.mxu0 %v789_v24  ;;  %737 = vmatprep.mubr.msk.bf16.mxu1 %vm853_vm7, %v851_v43 }
  0x94   :  { %v496_v60 = vmul.f32 0.2, %v494_v56  ;;  %v497_v61 = vmul.f32 0.2, %v495_v57  ;;  %731 = vmatprep.mubr.msk.bf16.mxu0 %vm853_vm7, %v851_v43  ;;  %741 = vmatprep.subr.bf16.mxu0 %v851_v43 }
  0x95   :  { %220 = vmax.xlane.f32.xlu0 %v219_v55  ;;  %v360_v62 = vsel %vm76_vm2, %v938_v58, -inf  ;;  %v363_v1 = vsel %vm76_vm2, %v940_v59, -inf }
  0x96   :  { %v498_v63 = vmax.f32 %v494_v56, %v496_v60  ;;  %361 = vmax.xlane.f32.xlu1 %v360_v62  ;;  %v499_v0 = vmax.f32 %v495_v57, %v497_v61 }
  0x98   :  { %v946_v2 = vadd.f32 %v719_v23, %v498_v63  ;;  %v948_v5 = vadd.f32 %v720_v30, %v499_v0 }
  0x99   :  { %364 = vmax.xlane.f32.xlu0 %v363_v1 }
  0x9a   :  { %v504_v8 = vsel %vm76_vm2, %v946_v2, -inf  ;;  %v507_v9 = vsel %vm76_vm2, %v948_v5, -inf }
  0x9b   :  { %505 = vmax.xlane.f32.xlu1 %v504_v8 }
  0x9d   :  { %508 = vmax.xlane.f32.xlu0 %v507_v9 }
 0x11a   :  { %v79_v11 = vpop.xlane.xlu1 %78 }
 0x11b   :  { %v83_v12 = vmax.f32 %v74_v10, %v79_v11 }
 0x11d   :  { %192 = vst.msk [vmem:[#allocation2] sm:$0xff] %vm119_vm3, %v83_v12  ;;  %v85_v16 = vsub.f32 %v74_v10, %v83_v12 }
 0x11e   :  { %v82_v14 = vpop.xlane.xlu0 %81  ;;  %v218_v19 = vpop.xlane.xlu1 %217 }
 0x11f   :  { %v84_v15 = vmax.f32 %v75_v13, %v82_v14  ;;  %v87_v17 = vmul.f32 1.442695, %v85_v16 }
 0x121   :  { %193 = vst.msk [vmem:[#allocation2 + $0x8] sm:$0xff] %vm119_vm3, %v84_v15  ;;  %790 = vpow2.f32 %v87_v17  ;;  %v86_v39 = vsub.f32 %v75_v13, %v84_v15 }
 0x122   :  { %v221_v22 = vpop.xlane.xlu0 %220 }
 0x123   :  { %v362_v25 = vpop.xlane.xlu1 %361  ;;  %v89_v47 = vmul.f32 1.442695, %v86_v39 }
 0x124   :  { %v956_v18 = vld [vmem:[#allocation2] sm:$0xff] }
 0x125   :  { %v959_v20 = vmax.f32 %v956_v18, %v218_v19 }
 0x126   :  { %v365_v28 = vpop.xlane.xlu0 %364 }
 0x127   :  { %336 = vst.msk [vmem:[#allocation2] sm:$0xff] %vm258_vm4, %v959_v20  ;;  %232 = vperm.xlu1 %777, %v959_v20   ;;  %v224_v48 = vsub.f32 %v956_v18, %v959_v20 }
 0x128   :  { %v215_v21 = vld [vmem:[#allocation2 + $0x8] sm:$0xff]  ;;  %v506_v33 = vpop.xlane.xlu1 %505 }
 0x129   :  { %v223_v23 = vmax.f32 %v215_v21, %v221_v22  ;;  %v226_v52 = vmul.f32 1.442695, %v224_v48 }
 0x12a   :  { %v509_v40 = vpop.xlane.xlu0 %508 }
 0x12b   :  { %337 = vst.msk [vmem:[#allocation2 + $0x8] sm:$0xff] %vm258_vm4, %v223_v23  ;;  %237 = vperm.xlu0 %778, %v223_v23   ;;  %779 = vset.pattern.permute.xlu1 %v846_v3  ;;  %v971_v29 = vpop.eup %790  ;;  %v225_v51 = vsub.f32 %v215_v21, %v223_v23 }
 0x12c   :  { %93 = vperm.xlu1 %779, %v83_v12  }
 0x12d   :  { %v228_v53 = vmul.f32 1.442695, %v225_v51 }
 0x12e   :  { %v358_v26 = vld [vmem:[#allocation2] sm:$0xff] }
 0x12f   :  { %v366_v27 = vmax.f32 %v358_v26, %v362_v25  ;;  %564 = vrot.lane.b32.xlu0 %v789_v24, %s850_s29 }
 0x130   :  { %98 = vperm.xlu1 %779, %v84_v15   ;;  %782 = vset.pattern.permute.xlu0 %v846_v3 }
 0x131   :  { %480 = vst.msk [vmem:[#allocation2] sm:$0xff] %vm402_vm5, %v366_v27  ;;  %v368_v54 = vsub.f32 %v358_v26, %v366_v27 }
 0x132   :  { %v359_v30 = vld [vmem:[#allocation2 + $0x8] sm:$0xff] }
 0x133   :  { %v367_v31 = vmax.f32 %v359_v30, %v365_v28  ;;  %126 = vperm.xlu0 %782, %v971_v29   ;;  %v370_v56 = vmul.f32 1.442695, %v368_v54 }
 0x134   :  { %780 = vset.pattern.permute.xlu1 %v848_v6 }
 0x135   :  { %v369_v32 = vsub.f32 %v359_v30, %v367_v31  ;;  %481 = vst.msk [vmem:[#allocation2 + $0x8] sm:$0xff] %vm402_vm5, %v367_v31  ;;  %376 = vperm.xlu1 %780, %v366_v27  }
 0x137   :  { %v372_v34 = vmul.f32 1.442695, %v369_v32  ;;  %786 = vset.pattern.permute.xlu0 %v848_v6 }
 0x138   :  { %v977_v37 = vld [vmem:[#allocation2] sm:$0xff] }
 0x139   :  { %792 = vpow2.f32 %v372_v34  ;;  %v980_v38 = vmax.f32 %v977_v37, %v506_v33  ;;  %381 = vperm.xlu1 %780, %v367_v31  }
 0x13a   :  { %794 = vpow2.f32 %v89_v47 }
 0x13b   :  { %v512_v41 = vsub.f32 %v977_v37, %v980_v38  ;;  %624 = vst.msk [vmem:[#allocation2] sm:$0xff] %vm546_vm6, %v980_v38  ;;  %796 = vpow2.f32 %v226_v52 }
 0x13c   :  { %v986_v42 = vld [vmem:[#allocation2 + $0x8] sm:$0xff]  ;;  %798 = vpow2.f32 %v228_v53 }
 0x13d   :  { %v991_v46 = vmax.f32 %v986_v42, %v509_v40  ;;  %276 = vrot.lane.b32.xlu1 %v789_v24, %s852_s4  ;;  %800 = vpow2.f32 %v370_v56  ;;  %v107_v56 = vld [vmem:[#allocation3] sm:$0xff] }
 0x13e   :  { %781 = vset.pattern.permute.xlu1 %v849_v7 }
 0x13f   :  { %v513_v49 = vsub.f32 %v986_v42, %v991_v46  ;;  %625 = vst.msk [vmem:[#allocation2 + $0x8] sm:$0xff] %vm546_vm6, %v991_v46 }
 0x141   :  { %520 = vperm.xlu1 %781, %v980_v38  }
 0x143   :  { %v1006_v50 = vpop.eup %792 }
 0x144   :  { %414 = vperm.xlu0 %786, %v1006_v50   ;;  %v1012_v55 = vpop.eup %794 }
 0x145   :  { %525 = vperm.xlu1 %781, %v991_v46   ;;  %v1015_v57 = vpop.eup %796 }
 0x146   :  { %v1019_v60 = vpop.eup %798 }
 0x147   :  { %v1022_v61 = vpop.eup %800 }
 0x148   :  { %788 = vset.pattern.permute.xlu0 %v849_v7 }
 0x149   :  { %420 = vrot.lane.b32.xlu1 %v789_v24, %s854_s30 }
 0x14a   :  { %783 = vset.pattern.permute.xlu1 %v846_v3 }
 0x14d   :  { %131 = vperm.xlu1 %783, %v1012_v55  }
 0x151   :  { %784 = vset.pattern.permute.xlu1 %v847_v4 }
 0x152   :  { %265 = vperm.xlu1 %784, %v1015_v57  }
 0x156   :  { %270 = vperm.xlu1 %784, %v1019_v60  }
 0x15a   :  { %785 = vset.pattern.permute.xlu1 %v848_v6 }
 0x15b   :  { %409 = vperm.xlu1 %785, %v1022_v61  }
 0x15f   :  { %787 = vset.pattern.permute.xlu1 %v849_v7 }
 0x1a6   :  { %v233_v3 = vpop.permute.xlu1 %232 }
 0x1a7   :  { %v240_v62 = vsub.f32 %v924_v36, %v233_v3  ;;  %v109_v3 = vmul.f32 %v971_v29, %v107_v56 }
 0x1a9   :  { %v242_v8 = vmul.f32 1.442695, %v240_v62 }
 0x1aa   :  { %v238_v63 = vpop.permute.xlu0 %237 }
 0x1ab   :  { %v241_v4 = vsub.f32 %v930_v45, %v238_v63  ;;  %v94_v0 = vpop.permute.xlu1 %93 }
 0x1ac   :  { %v101_v1 = vsub.f32 %v922_v35, %v94_v0 }
 0x1ad   :  { %v244_v9 = vmul.f32 1.442695, %v241_v4  ;;  %v108_v4 = vld [vmem:[#allocation3 + $0x8] sm:$0xff] }
 0x1ae   :  { %v103_v10 = vmul.f32 1.442695, %v101_v1  ;;  %v565_v23 = vpop.permute.xlu0 %564  ;;  %v110_v1 = vmul.f32 %v1012_v55, %v108_v4  ;;  %v514_v55 = vmul.f32 1.442695, %v512_v41  ;;  %v122_v41 = vld [vmem:[#allocation4] sm:$0xff] }
 0x1af   :  { %v99_v11 = vpop.permute.xlu1 %98 }
 0x1b0   :  { %802 = vpow2.f32 %v103_v10  ;;  %v102_v6 = vsub.f32 %v928_v44, %v99_v11 }
 0x1b1   :  { %804 = vpow2.f32 %v242_v8 }
 0x1b2   :  { %806 = vpow2.f32 %v244_v9  ;;  %v105_v12 = vmul.f32 1.442695, %v102_v6  ;;  %v127_v53 = vpop.permute.xlu0 %126 }
 0x1b4   :  { %808 = vpow2.f32 %v105_v12  ;;  %v377_v7 = vpop.permute.xlu1 %376 }
 0x1b5   :  { %v384_v36 = vsub.f32 %v938_v58, %v377_v7 }
 0x1b7   :  { %v386_v13 = vmul.f32 1.442695, %v384_v36 }
 0x1b8   :  { %v382_v14 = vpop.permute.xlu1 %381 }
 0x1b9   :  { %810 = vpow2.f32 %v386_v13  ;;  %v385_v45 = vsub.f32 %v940_v59, %v382_v14 }
 0x1ba   :  { %v803_v35 = vpop.eup %802 }
 0x1bb   :  { %v805_v15 = vpop.eup %804  ;;  %v388_v16 = vmul.f32 1.442695, %v385_v45  ;;  %v111_v17 = vsel %vm76_vm2, %v803_v35, 0.0 }
 0x1bc   :  { %v807_v18 = vpop.eup %806  ;;  %112 = vadd.xlane.f32.xlu1 %v111_v17  ;;  %v277_v44 = vpop.permute.xlu1 %276  ;;  %v250_v58 = vsel %vm76_vm2, %v805_v15, 0.0 }
 0x1bd   :  { %812 = vpow2.f32 %v388_v16  ;;  %736 = vmatpush3.bf16.msra.mxu1 %v277_v44  ;;  %v275_v21 = vpack.c.bf16 %v807_v18, %v805_v15  ;;  %v253_v27 = vsel %vm76_vm2, %v807_v18, 0.0 }
 0x1be   :  { %v809_v19 = vpop.eup %808  ;;  %747 = vmatprep.subr.bf16.mxu1 %v851_v43 }
 0x1bf   :  { %v114_v20 = vsel %vm76_vm2, %v809_v19, 0.0  ;;  %v136_v22 = vpack.c.bf16 %v809_v19, %v803_v35 }
 0x1c0   :  { %251 = vadd.xlane.f32.xlu1 %v250_v58  ;;  %115 = vadd.xlane.f32.xlu0 %v114_v20  ;;  %v521_v59 = vpop.permute.xlu1 %520  ;;  %v134_v58 = vmul.f32 %v127_v53, %v122_v41 }
 0x1c1   :  { %738 = vmatmul.mubr.msk.bf16.vlgmr.msra.gmra.mrb[0].mxu1 %vm76_vm2, %v275_v21  ;;  %v528_v24 = vsub.f32 %v946_v2, %v521_v59  ;;  %732 = vmatmul.mubr.msk.bf16.vlgmr.msra.gmra.mrb[0].mxu0 %vm76_vm2, %v136_v22 }
 0x1c2   :  { %743 = vmatprep.mubr.msk.bf16.mxu0 %vm853_vm7, %v851_v43  ;;  %748 = vmatpush3.bf16.msra.mxu1 %v565_v23 }
 0x1c3   :  { %v811_v25 = vpop.eup %810  ;;  %v530_v26 = vmul.f32 1.442695, %v528_v24  ;;  %749 = vmatprep.mubr.msk.bf16.mxu1 %vm853_vm7, %v851_v43  ;;  %v1061_v62 = vpop.permute.xlu0 %414 }
 0x1c4   :  { %254 = vadd.xlane.f32.xlu0 %v253_v27  ;;  %v526_v28 = vpop.permute.xlu1 %525  ;;  %v394_v30 = vsel %vm76_vm2, %v811_v25, 0.0 }
 0x1c5   :  { %814 = vpow2.f32 %v530_v26  ;;  %v529_v2 = vsub.f32 %v948_v5, %v526_v28  ;;  %395 = vadd.xlane.f32.xlu1 %v394_v30  ;;  %v516_v30 = vmul.f32 1.442695, %v513_v49 }
 0x1c7   :  { %v813_v31 = vpop.eup %812  ;;  %v532_v32 = vmul.f32 1.442695, %v529_v2 }
 0x1c8   :  { %v421_v33 = vpop.permute.xlu1 %420  ;;  %v397_v34 = vsel %vm76_vm2, %v813_v31, 0.0  ;;  %v419_v39 = vpack.c.bf16 %v813_v31, %v811_v25 }
 0x1c9   :  { %816 = vpow2.f32 %v532_v32  ;;  %398 = vadd.xlane.f32.xlu0 %v397_v34  ;;  %742 = vmatpush3.bf16.msra.mxu0 %v421_v33 }
 0x1ca   :  { %818 = vpow2.f32 %v514_v55 }
 0x1cb   :  { %820 = vpow2.f32 %v516_v30 }
 0x1cc   :  { %744 = vmatmul.mubr.msk.bf16.vlgmr.msra.gmra.mrb[4].mxu0 %vm76_vm2, %v419_v39  ;;  %v132_v48 = vpop.permute.xlu1 %131 }
 0x1cf   :  { %v815_v40 = vpop.eup %814 }
 0x1d0   :  { %v538_v43 = vsel %vm76_vm2, %v815_v40, 0.0 }
 0x1d1   :  { %539 = vadd.xlane.f32.xlu1 %v538_v43  ;;  %v1054_v51 = vpop.permute.xlu1 %265 }
 0x1d3   :  { %v1050_v47 = vpop.eup %816 }
 0x1d4   :  { %v563_v5 = vpack.c.bf16 %v1050_v47, %v815_v40  ;;  %v819_v18 = vpop.eup %818  ;;  %v541_v42 = vsel %vm76_vm2, %v1050_v47, 0.0 }
 0x1d5   :  { %v1056_v52 = vpop.permute.xlu1 %270  ;;  %v821_v34 = vpop.eup %820 }
 0x1d6   :  { %750 = vmatmul.mubr.msk.bf16.vlgmr.msra.gmra.mrb[4].mxu1 %vm76_vm2, %v563_v5 }
 0x1da   :  { %v1058_v54 = vpop.permute.xlu1 %409 }
 0x249   :  { %v113_v63 = vpop.xlane.xlu1 %112 }
 0x24a   :  { %v117_v0 = vadd.f32 %v113_v63, %v109_v3 }
 0x24c   :  { %120 = vst.msk [vmem:[#allocation3] sm:$0xff] %vm119_vm3, %v117_v0 }
 0x24d   :  { %v116_v8 = vpop.xlane.xlu0 %115  ;;  %v252_v6 = vpop.xlane.xlu1 %251 }
 0x24e   :  { %v118_v9 = vadd.f32 %v116_v8, %v110_v1 }
 0x250   :  { %121 = vst.msk [vmem:[#allocation3 + $0x8] sm:$0xff] %vm119_vm3, %v118_v9 }
 0x251   :  { %v255_v36 = vpop.xlane.xlu0 %254 }
 0x253   :  { %v246_v10 = vld [vmem:[#allocation3] sm:$0xff] }
 0x254   :  { %v248_v11 = vmul.f32 %v1015_v57, %v246_v10  ;;  %v396_v57 = vpop.xlane.xlu1 %395 }
 0x256   :  { %v256_v12 = vadd.f32 %v252_v6, %v248_v11 }
 0x257   :  { %v247_v7 = vld [vmem:[#allocation3 + $0x8] sm:$0xff] }
 0x258   :  { %259 = vst.msk [vmem:[#allocation3] sm:$0xff] %vm258_vm4, %v256_v12  ;;  %v249_v29 = vmul.f32 %v1019_v60, %v247_v7  ;;  %v399_v60 = vpop.xlane.xlu0 %398 }
 0x25a   :  { %v257_v13 = vadd.f32 %v255_v36, %v249_v29 }
 0x25c   :  { %260 = vst.msk [vmem:[#allocation3 + $0x8] sm:$0xff] %vm258_vm4, %v257_v13 }
 0x25e   :  { %v540_v37 = vpop.xlane.xlu1 %539 }
 0x25f   :  { %v390_v14 = vld [vmem:[#allocation3] sm:$0xff] }
 0x260   :  { %v392_v45 = vmul.f32 %v1022_v61, %v390_v14  ;;  %v123_v61 = vld [vmem:[#allocation4 + $0x8] sm:$0xff] }
 0x261   :  { %v135_v22 = vmul.f32 %v132_v48, %v123_v61 }
 0x262   :  { %v400_v35 = vadd.f32 %v396_v57, %v392_v45 }
 0x263   :  { %v391_v15 = vld [vmem:[#allocation3 + $0x8] sm:$0xff] }
 0x264   :  { %403 = vst.msk [vmem:[#allocation3] sm:$0xff] %vm402_vm5, %v400_v35  ;;  %v393_v16 = vmul.f32 %v1006_v50, %v391_v15 }
 0x266   :  { %v401_v17 = vadd.f32 %v399_v60, %v393_v16 }
 0x268   :  { %404 = vst.msk [vmem:[#allocation3 + $0x8] sm:$0xff] %vm402_vm5, %v401_v17 }
 0x26b   :  { %v534_v44 = vld [vmem:[#allocation3] sm:$0xff] }
 0x26c   :  { %v536_v19 = vmul.f32 %v819_v18, %v534_v44 }
 0x26e   :  { %v544_v38 = vadd.f32 %v540_v37, %v536_v19 }
 0x26f   :  { %v535_v13 = vld [vmem:[#allocation3 + $0x8] sm:$0xff] }
 0x270   :  { %547 = vst.msk [vmem:[#allocation3] sm:$0xff] %vm546_vm6, %v544_v38  ;;  %v537_v55 = vmul.f32 %v821_v34, %v535_v13 }
 0x294   :  { %v316_v20 = vpop.f32.mrb[0].mxu1  ;;  %v180_v21 = vpop.f32.mrb[0].mxu0 }
 0x295   :  { %v187_v59 = vadd.f32 %v180_v21, %v134_v58  ;;  %325 = vrot.lane.b32.xlu0 %v316_v20, %s855_s7  ;;  %v739_v50 = vpop.f32.mrb[1].mxu1  ;;  %v733_v23 = vpop.f32.mrb[1].mxu0 }
 0x296   :  { %v319_v24 = vpop.f32.mrb[2].mxu1  ;;  %v183_v25 = vpop.f32.mrb[2].mxu0 }
 0x297   :  { %190 = vst.msk [vmem:[#allocation4] sm:$0xff] %vm189_vm8, %v187_v59  ;;  %v188_v26 = vadd.f32 %v183_v25, %v135_v22  ;;  %v740_v27 = vpop.f32.mrb[3].mxu1  ;;  %327 = vrot.lane.b32.xlu1 %v319_v24, %s855_s7  ;;  %v734_v28 = vpop.f32.mrb[3].mxu0 }
 0x299   :  { %191 = vst.msk [vmem:[#allocation4 + $0x8] sm:$0xff] %vm189_vm8, %v188_v26 }
 0x29b   :  { %553 = vperm.xlu1 %787, %v819_v18  }
 0x29e   :  { %v261_v46 = vld [vmem:[#allocation4] sm:$0xff] }
 0x29f   :  { %v460_v2 = vpop.f32.mrb[4].mxu0  ;;  %v273_v48 = vmul.f32 %v1054_v51, %v261_v46 }
 0x2a0   :  { %469 = vrot.lane.b32.xlu1 %v460_v2, %s856_s8  ;;  %v745_v31 = vpop.f32.mrb[5].mxu0  ;;  %v262_v49 = vld [vmem:[#allocation4 + $0x8] sm:$0xff] }
 0x2a1   :  { %v463_v32 = vpop.f32.mrb[6].mxu0  ;;  %v274_v3 = vmul.f32 %v1056_v52, %v262_v49 }
 0x2a2   :  { %v746_v33 = vpop.f32.mrb[7].mxu0 }
 0x2a4   :  { %471 = vrot.lane.b32.xlu1 %v463_v32, %s856_s8 }
 0x2a8   :  { %558 = vperm.xlu1 %787, %v821_v34  }
 0x2a9   :  { %v604_v39 = vpop.f32.mrb[4].mxu1 }
 0x2aa   :  { %v751_v40 = vpop.f32.mrb[5].mxu1 }
 0x2ab   :  { %v607_v43 = vpop.f32.mrb[6].mxu1 }
 0x2ac   :  { %v752_v5 = vpop.f32.mrb[7].mxu1  ;;  %613 = vrot.lane.b32.xlu1 %v604_v39, %s857_s9 }
 0x2b4   :  { %542 = vadd.xlane.f32.xlu0 %v541_v42 }
 0x2ca   :  { %615 = vrot.lane.b32.xlu0 %v607_v43, %s857_s9 }
 0x307   :  { %v326_v53 = vpop.permute.xlu0 %325 }
 0x308   :  { %v331_v56 = vadd.f32 %v326_v53, %v273_v48 }
 0x309   :  { %v328_v63 = vpop.permute.xlu1 %327 }
 0x30a   :  { %334 = vst.msk [vmem:[#allocation4] sm:$0xff] %vm333_vm9, %v331_v56  ;;  %v332_v4 = vadd.f32 %v328_v63, %v274_v3 }
 0x30c   :  { %335 = vst.msk [vmem:[#allocation4 + $0x8] sm:$0xff] %vm333_vm9, %v332_v4 }
 0x311   :  { %v405_v1 = vld [vmem:[#allocation4] sm:$0xff] }
 0x312   :  { %v417_v8 = vmul.f32 %v1058_v54, %v405_v1 }
 0x313   :  { %v406_v9 = vld [vmem:[#allocation4 + $0x8] sm:$0xff] }
 0x314   :  { %v418_v51 = vmul.f32 %v1061_v62, %v406_v9 }
 0x31a   :  { %v554_v0 = vpop.permute.xlu1 %553 }
 0x31e   :  { %v470_v47 = vpop.permute.xlu1 %469 }
 0x31f   :  { %v475_v10 = vadd.f32 %v470_v47, %v417_v8 }
 0x321   :  { %478 = vst.msk [vmem:[#allocation4] sm:$0xff] %vm477_vm10, %v475_v10 }
 0x322   :  { %v472_v11 = vpop.permute.xlu1 %471 }
 0x323   :  { %v476_v6 = vadd.f32 %v472_v11, %v418_v51 }
 0x325   :  { %479 = vst.msk [vmem:[#allocation4 + $0x8] sm:$0xff] %vm477_vm10, %v476_v6 }
 0x327   :  { %v559_v12 = vpop.permute.xlu1 %558 }
 0x328   :  { %v549_v52 = vld [vmem:[#allocation4] sm:$0xff] }
 0x329   :  { %v561_v7 = vmul.f32 %v554_v0, %v549_v52 }
 0x32b   :  { %v614_v29 = vpop.permute.xlu1 %613 }
 0x32c   :  { %v619_v36 = vadd.f32 %v614_v29, %v561_v7  ;;  %v550_v54 = vld [vmem:[#allocation4 + $0x8] sm:$0xff] }
 0x32d   :  { %v562_v57 = vmul.f32 %v559_v12, %v550_v54 }
 0x32e   :  { %622 = vst.msk [vmem:[#allocation4] sm:$0xff] %vm621_vm11, %v619_v36 }
 0x341   :  { %v543_v14 = vpop.xlane.xlu0 %542 }
 0x342   :  { %v545_v45 = vadd.f32 %v543_v14, %v537_v55 }
 0x344   :  { %548 = vst.msk [vmem:[#allocation3 + $0x8] sm:$0xff] %vm546_vm6, %v545_v45 }
 0x345   :  { %v616_v35 = vpop.permute.xlu0 %615 }
 0x346   :  { %v620_v62 = vadd.f32 %v616_v35, %v562_v57 }
 0x348   :  { %623 = vst.msk [vmem:[#allocation4 + $0x8] sm:$0xff] %vm621_vm11, %v620_v62 }
 0x349 PF:  { %v631_v15 = vld [vmem:[#allocation3] sm:$0xff]  ;;  %v858_v16 = vmov 1   ;;  %v859_v60 = vmov 0   ;;  %v860_v18 = vmov 2   ;;  %v861_v44 = vmov 3   ;;  %v629_v24 = vld [vmem:[#allocation4] sm:$0xff] }
 0x34a   :  { %823 = vset.pattern.permute.xlu1 %v858_v16  ;;  %822 = vset.pattern.permute.xlu0 %v859_v60  ;;  %vm683_vm12 = vcmask 64512   ;;  %vm686_vm13 = vcmask 130048   ;;  %vm689_vm14 = vcmask 195584   ;;  %v716_v43 = vld [vmem:[%s1104_s5] ss:$0 sm:$0xff] }
 0x34b   :  { %648 = vperm.xlu1 %823, %v631_v15   ;;  %635 = vperm.xlu0 %822, %v631_v15   ;;  %v632_v17 = vld [vmem:[#allocation3 + $0x8] sm:$0xff] }
 0x34f   :  { %652 = vperm.xlu1 %823, %v632_v17   ;;  %640 = vperm.xlu0 %822, %v632_v17   ;;  %v630_v26 = vld [vmem:[#allocation4 + $0x8] sm:$0xff] }
 0x353   :  { %825 = vset.pattern.permute.xlu1 %v860_v18  ;;  %824 = vset.pattern.permute.xlu0 %v860_v18 }
 0x354   :  { %664 = vperm.xlu1 %825, %v632_v17   ;;  %660 = vperm.xlu0 %824, %v631_v15  }
 0x358   :  { %826 = vset.pattern.permute.xlu1 %v861_v44  ;;  %827 = vset.pattern.permute.xlu0 %v861_v44 }
 0x359   :  { %672 = vperm.xlu1 %826, %v631_v15   ;;  %676 = vperm.xlu0 %827, %v632_v17  }
 0x3ca   :  { %v649_v19 = vpop.permute.xlu1 %648  ;;  %v636_v37 = vpop.permute.xlu0 %635 }
 0x3cb   :  { %828 = vrcp.f32 %v649_v19 }
 0x3cc   :  { %830 = vrcp.f32 %v636_v37 }
 0x3ce   :  { %v653_v38 = vpop.permute.xlu1 %652  ;;  %v641_v41 = vpop.permute.xlu0 %640 }
 0x3cf   :  { %832 = vrcp.f32 %v653_v38 }
 0x3d0   :  { %834 = vrcp.f32 %v641_v41 }
 0x3d3   :  { %v665_v61 = vpop.permute.xlu1 %664  ;;  %v661_v58 = vpop.permute.xlu0 %660 }
 0x3d4   :  { %836 = vrcp.f32 %v665_v61 }
 0x3d5   :  { %838 = vrcp.f32 %v661_v58  ;;  %v829_v22 = vpop.eup %828 }
 0x3d6   :  { %v831_v59 = vpop.eup %830  ;;  %v656_v28 = vmul.f32 %v829_v22, %v629_v24 }
 0x3d7   :  { %v644_v30 = vmul.f32 %v831_v59, %v629_v24 }
 0x3d8   :  { %v673_v20 = vpop.permute.xlu1 %672  ;;  %v677_v21 = vpop.permute.xlu0 %676 }
 0x3d9   :  { %840 = vrcp.f32 %v673_v20  ;;  %v833_v50 = vpop.eup %832  ;;  %v684_v40 = vsel %vm683_vm12, %v644_v30, %v656_v28 }
 0x3da   :  { %842 = vrcp.f32 %v677_v21  ;;  %v835_v23 = vpop.eup %834  ;;  %v658_v2 = vmul.f32 %v833_v50, %v630_v26 }
 0x3db   :  { %v646_v31 = vmul.f32 %v835_v23, %v630_v26 }
 0x3dd   :  { %v685_v42 = vsel %vm683_vm12, %v646_v31, %v658_v2 }
 0x3de   :  { %v837_v25 = vpop.eup %836 }
 0x3df   :  { %v839_v27 = vpop.eup %838  ;;  %v670_v33 = vmul.f32 %v837_v25, %v630_v26 }
 0x3e0   :  { %v668_v32 = vmul.f32 %v839_v27, %v629_v24 }
 0x3e1   :  { %v688_v48 = vsel %vm686_vm13, %v685_v42, %v670_v33 }
 0x3e2   :  { %v687_v46 = vsel %vm686_vm13, %v684_v40, %v668_v32 }
 0x3e3   :  { %v841_v34 = vpop.eup %840 }
 0x3e4   :  { %v843_v39 = vpop.eup %842  ;;  %v680_v5 = vmul.f32 %v841_v34, %v629_v24 }
 0x3e5   :  { %v682_v49 = vmul.f32 %v843_v39, %v630_v26 }
 0x3e6   :  { %v690_v53 = vsel %vm689_vm14, %v687_v46, %v680_v5 }
 0x3e7   :  { %v699_v56 = vadd.f32 %v716_v43, %v690_v53  ;;  %v691_v3 = vsel %vm689_vm14, %v688_v48, %v682_v49 }
 0x3e8   :  { %v700_v63 = vadd.f32 %v716_v43, %v691_v3 }
 0x3e9   :  { %v701_v4 = vmax.f32 %v699_v56, 0.0 }
 0x3ea   :  { %v702_v0 = vmax.f32 %v700_v63, 0.0 }
 0x3eb   :  { %704 = vst.msk [vmem:[%s1105_s6] sm:$0xff] %vm32_vm1, %v701_v4 }
 0x3ec   :  { %705 = vst.msk [vmem:[%s1105_s6 + $0x8] sm:$0xff] %vm32_vm1, %v702_v0 }

</bundles_post_ra>
